<compile_context>
chip_gen: v5e
topology: v5e:2x2
jax: 0.10.0
libtpu: 0.0.40
codegen_flags: <defaults>
</compile_context>

<pallas_src>
import functools

import jax
import jax.numpy as jnp
import numpy as np
from jax.experimental import pallas as pl
from jax.experimental.pallas import tpu as pltpu


def _event_extract_kernel(H, K, MISC_W,
                          x_ref,
                          e1w, e1b, e2w, e2b, e3w, e3b,
                          ds1w, ds1b,
                          ds2tw, ds2bw, ds2b,
                          ds3tw, ds3bw, ds3b,
                          ecpw, ecpb, smseg,
                          ccw, ccb,
                          chexp, evtile,
                          evst_out, evrep_out, misc_out):
    x = x_ref[...]
    TB = x.shape[0]

    def mm(a, w_ref):
        return jnp.dot(a, w_ref[...], preferred_element_type=jnp.float32)

    relu = lambda v: jnp.maximum(v, 0.0)
    cat = lambda a, b: jnp.concatenate([a, b], axis=-1)

    # TODO(synk): nn.Dropout is a no-op here (inference/eval mode), matching model.eval().
    h1 = relu(mm(x, e1w) + e1b[...])
    h2 = relu(mm(cat(x, h1), e2w) + e2b[...])      # single K=2H MXU matmul
    h3 = relu(mm(cat(x, h2), e3w) + e3b[...])

    # Lane-packed decoder stacks: lanes [0:H] = event path, lanes [H:2H] = style path.
    ds1 = relu(mm(h3, ds1w) + ds1b[...])                      # [TB, 2H] = [d1 | s1]
    ds2 = relu(mm(h3, ds2tw) + mm(ds1, ds2bw) + ds2b[...])    # [TB, 2H] = [d2 | s2]
    evst = relu(mm(h3, ds3tw) + mm(ds2, ds3bw) + ds3b[...])   # [TB, 2H] = [event | style]

    # Packed classifier: one block-diag matmul gives both logit halves,
    # per-half softmax denominators via a constant [2K, 2K] block-ones matmul.
    logits = mm(evst, ecpw) + ecpb[...]                       # [TB, 2K]
    m = jnp.max(logits, axis=-1, keepdims=True)               # common shift (cancels per half)
    e = jnp.exp(logits - m)
    denom = jnp.dot(e, smseg[...], preferred_element_type=jnp.float32)
    # TODO(synk): approx=True would route the divide to the idle EUP slot but does not
    # reliably hold the 2e-5 validation tolerance, so keep the exact reciprocal.
    sm = e * pl.reciprocal(denom, approx=False)               # [TB, 2K] = [channel | style]

    # Reconstruction error of concat_classifer output vs. the input.
    diff = (mm(evst, ccw) + ccb[...]) - x
    row_sse = jnp.sum(diff * diff, axis=-1, keepdims=True)    # [TB, 1]

    # event_rep = channel_softmax[:, k] * event_decoder[:, h] laid out as [TB, K*H],
    # built with two constant matmuls + one elementwise multiply (no per-lane slices).
    evrep_out[...] = mm(sm, chexp) * mm(evst, evtile)         # [TB, K*H]

    evst_out[...] = evst                                      # [TB, 2H], lane-dense
    pad = jnp.zeros((TB, MISC_W - 2 * K - 1), jnp.float32)
    misc_out[...] = jnp.concatenate([sm, row_sse, pad], axis=-1)   # [TB, 128], lane-dense


_PARAM_ORDER = [
    "e1_w", "e1_b", "e2_w", "e2_b", "e3_w", "e3_b",
    "ed1_w", "ed1_b", "ed2_w", "ed2_b", "ed3_w", "ed3_b",
    "sd1_w", "sd1_b", "sd2_w", "sd2_b", "sd3_w", "sd3_b",
    "ec_w", "ec_b", "cc_w", "cc_b",
]


def _full_block_spec(arr):
    """Whole array as one block; constant index_map keeps it VMEM-resident."""
    n = arr.ndim
    return pl.BlockSpec(arr.shape, lambda i, n=n: (0,) * n)


def _pick_block_b(B, cap=1024):
    """Largest useful batch tile.

    Small B -> one grid step (per-step overhead ~0.35 us dominates otherwise).
    Large B -> largest divisor (multiple of 8) <= cap leaving >= 2 grid steps,
    so the "parallel" batch axis can shard across both v7x TensorCores while
    the double-buffered per-step footprint stays within v5e's 16 MiB scoped
    VMEM default (cap=1024 rows -> ~8.5 MB including weights).
    """
    if B <= 512:
        return B
    best = None
    for d in range(8, min(cap, B // 2) + 1, 8):
        if B % d == 0:
            best = d
    return best if best is not None else B


def event_extract_dec_naml2(news_rep, params, block_b=None):
    B, H = news_rep.shape
    K = params["ec_b"].shape[-1]
    MISC_W = max(128, ((2 * K + 1 + 127) // 128) * 128)

    if block_b is None:
        block_b = _pick_block_b(B)
    assert B % block_b == 0, "batch must be divisible by the batch tile"
    grid = (B // block_b,)

    f32 = jnp.float32
    zHH = jnp.zeros((H, H), f32)
    zHK = jnp.zeros((H, K), f32)

    # ed1/sd1 -> one [H, 2H] head.
    ds1_w = jnp.concatenate([params["ed1_w"], params["sd1_w"]], axis=1)
    ds1_b = jnp.concatenate([params["ed1_b"], params["sd1_b"]], axis=1)
    # ed2/sd2 -> [H, 2H] (h3 part) + block-diagonal [2H, 2H] ([d1|s1] part).
    ds2_tw = jnp.concatenate([params["ed2_w"][:H], params["sd2_w"][:H]], axis=1)
    ds2_bw = jnp.concatenate(
        [jnp.concatenate([params["ed2_w"][H:], zHH], axis=1),
         jnp.concatenate([zHH, params["sd2_w"][H:]], axis=1)], axis=0)
    ds2_b = jnp.concatenate([params["ed2_b"], params["sd2_b"]], axis=1)
    # ed3/sd3 -> same packing; result lanes are directly [event_decoder | style_decoder].
    ds3_tw = jnp.concatenate([params["ed3_w"][:H], params["sd3_w"][:H]], axis=1)
    ds3_bw = jnp.concatenate(
        [jnp.concatenate([params["ed3_w"][H:], zHH], axis=1),
         jnp.concatenate([zHH, params["sd3_w"][H:]], axis=1)], axis=0)
    ds3_b = jnp.concatenate([params["ed3_b"], params["sd3_b"]], axis=1)
    # Shared classifier applied to both halves: block-diag [2H, 2K].
    ec_pw = jnp.concatenate(
        [jnp.concatenate([params["ec_w"], zHK], axis=1),
         jnp.concatenate([zHK, params["ec_w"]], axis=1)], axis=0)
    ec_pb = jnp.concatenate([params["ec_b"], params["ec_b"]], axis=1)
    # Segmented-softmax denominator matrix: blockdiag(ones(K,K), ones(K,K)).
    sm_seg = jnp.kron(jnp.eye(2, dtype=f32), jnp.ones((K, K), f32))
    # Constant matrices for the event_rep outer product.
    ch_expand = jnp.concatenate(
        [jnp.kron(jnp.eye(K, dtype=f32), jnp.ones((1, H), f32)),
         jnp.zeros((K, K * H), f32)], axis=0)                      # [2K, K*H]
    ev_tile = jnp.concatenate(
        [jnp.tile(jnp.eye(H, dtype=f32), (1, K)),
         jnp.zeros((H, K * H), f32)], axis=0)                      # [2H, K*H]

    weight_args = [
        params["e1_w"], params["e1_b"], params["e2_w"], params["e2_b"],
        params["e3_w"], params["e3_b"],
        ds1_w, ds1_b, ds2_tw, ds2_bw, ds2_b, ds3_tw, ds3_bw, ds3_b,
        ec_pw, ec_pb, sm_seg,
        params["cc_w"], params["cc_b"],
        ch_expand, ev_tile,
    ]

    in_specs = [pl.BlockSpec((block_b, H), lambda i: (i, 0))]
    in_specs += [_full_block_spec(w) for w in weight_args]

    out_shapes = (
        jax.ShapeDtypeStruct((B, 2 * H), jnp.float32),    # [event | style] decoder
        jax.ShapeDtypeStruct((B, K * H), jnp.float32),    # event_rep (flattened, row-major k*H+h)
        jax.ShapeDtypeStruct((B, MISC_W), jnp.float32),   # [channel_sm | style_sm | row SSE | 0-pad]
    )
    out_specs = (
        pl.BlockSpec((block_b, 2 * H), lambda i: (i, 0)),
        pl.BlockSpec((block_b, K * H), lambda i: (i, 0)),
        pl.BlockSpec((block_b, MISC_W), lambda i: (i, 0)),
    )

    evst, evrep_flat, misc = pl.pallas_call(
        functools.partial(_event_extract_kernel, H, K, MISC_W),
        grid=grid,
        out_shape=out_shapes,
        in_specs=in_specs,
        out_specs=out_specs,
        compiler_params=pltpu.CompilerParams(dimension_semantics=("parallel",)),
    )(news_rep, *weight_args)

    event_decoder = evst[:, :H]
    style_decoder = evst[:, H:]
    channel_softmax = misc[:, :K]
    style_softmax = misc[:, K:2 * K]
    loss_dec = jnp.sum(misc[:, 2 * K]) / (B * H)
    event_rep = evrep_flat.reshape(B, K, H)

    # Match PyTorch return: event_decoder is unsqueeze(1) -> [B, 1, H]; loss is a scalar.
    return (event_decoder[:, None, :], event_rep, channel_softmax,
            style_decoder, loss_dec, style_softmax)


def init_params(key, H, K):
    """Deterministic synthetic parameters (weights stored as [in, out])."""
    shapes = {
        "e1_w": (H, H), "e1_b": (1, H),
        "e2_w": (2 * H, H), "e2_b": (1, H),
        "e3_w": (2 * H, H), "e3_b": (1, H),
        "ed1_w": (H, H), "ed1_b": (1, H),
        "ed2_w": (2 * H, H), "ed2_b": (1, H),
        "ed3_w": (2 * H, H), "ed3_b": (1, H),
        "sd1_w": (H, H), "sd1_b": (1, H),
        "sd2_w": (2 * H, H), "sd2_b": (1, H),
        "sd3_w": (2 * H, H), "sd3_b": (1, H),
        "ec_w": (H, K), "ec_b": (1, K),
        "cc_w": (2 * H, H), "cc_b": (1, H),
    }
    params = {}
    keys = jax.random.split(key, len(shapes))
    for k, name in zip(keys, _PARAM_ORDER):
        fan_in = shapes[name][0] if name.endswith("_w") else shapes[name][1]
        bound = 1.0 / np.sqrt(fan_in)
        params[name] = jax.random.uniform(
            k, shapes[name], jnp.float32, minval=-bound, maxval=bound)
    return params


def _reference(x, p):
    """Pure-JAX reference mirroring the PyTorch forward (eval mode)."""
    relu = jax.nn.relu

    def lin(v, w, b):
        return v @ w + b

    cat = lambda a, b: jnp.concatenate([a, b], axis=-1)
    h1 = relu(lin(x, p["e1_w"], p["e1_b"]))
    h2 = relu(lin(cat(x, h1), p["e2_w"], p["e2_b"]))
    h3 = relu(lin(cat(x, h2), p["e3_w"], p["e3_b"]))
    d1 = relu(lin(h3, p["ed1_w"], p["ed1_b"]))
    d2 = relu(lin(cat(h3, d1), p["ed2_w"], p["ed2_b"]))
    ev = relu(lin(cat(h3, d2), p["ed3_w"], p["ed3_b"]))
    s1 = relu(lin(h3, p["sd1_w"], p["sd1_b"]))
    s2 = relu(lin(cat(h3, s1), p["sd2_w"], p["sd2_b"]))
    st = relu(lin(cat(h3, s2), p["sd3_w"], p["sd3_b"]))
    ch = jax.nn.softmax(lin(ev, p["ec_w"], p["ec_b"]), axis=-1)
    ss = jax.nn.softmax(lin(st, p["ec_w"], p["ec_b"]), axis=-1)
    allf = lin(cat(ev, st), p["cc_w"], p["cc_b"])
    loss = jnp.mean((allf - x) ** 2)
    evrep = ch[:, :, None] * ev[:, None, :]
    return ev[:, None, :], evrep, ch, st, loss, ss


if __name__ == "__main__":
    B, H, K = 32, 64, 8  # batch, cnn_kernel_num, K (number of event channels)

    key = jax.random.PRNGKey(0)
    pkey, xkey = jax.random.split(key)
    params = init_params(pkey, H, K)
    news_rep = jax.random.normal(xkey, (B, H), jnp.float32)

    outs = event_extract_dec_naml2(news_rep, params)  # block_b=B -> grid=(1,)
    outs = jax.block_until_ready(outs)

    refs = _reference(news_rep, params)
    for o, r in zip(outs, refs):
        np.testing.assert_allclose(np.asarray(o), np.asarray(r), rtol=2e-5, atol=2e-5)

    print("KERNEL_OK")
</pallas_src>

<mosaic_0001>
module attributes {stable_mosaic.version = 11 : i64} {
  func.func @_event_extract_kernel(%arg0: i32, %arg1: memref<32x64xf32, #tpu.memory_space<vmem>>, %arg2: memref<64x64xf32, #tpu.memory_space<vmem>>, %arg3: memref<1x64xf32, #tpu.memory_space<vmem>>, %arg4: memref<128x64xf32, #tpu.memory_space<vmem>>, %arg5: memref<1x64xf32, #tpu.memory_space<vmem>>, %arg6: memref<128x64xf32, #tpu.memory_space<vmem>>, %arg7: memref<1x64xf32, #tpu.memory_space<vmem>>, %arg8: memref<64x128xf32, #tpu.memory_space<vmem>>, %arg9: memref<1x128xf32, #tpu.memory_space<vmem>>, %arg10: memref<64x128xf32, #tpu.memory_space<vmem>>, %arg11: memref<128x128xf32, #tpu.memory_space<vmem>>, %arg12: memref<1x128xf32, #tpu.memory_space<vmem>>, %arg13: memref<64x128xf32, #tpu.memory_space<vmem>>, %arg14: memref<128x128xf32, #tpu.memory_space<vmem>>, %arg15: memref<1x128xf32, #tpu.memory_space<vmem>>, %arg16: memref<128x16xf32, #tpu.memory_space<vmem>>, %arg17: memref<1x16xf32, #tpu.memory_space<vmem>>, %arg18: memref<16x16xf32, #tpu.memory_space<vmem>>, %arg19: memref<128x64xf32, #tpu.memory_space<vmem>>, %arg20: memref<1x64xf32, #tpu.memory_space<vmem>>, %arg21: memref<16x512xf32, #tpu.memory_space<vmem>>, %arg22: memref<128x512xf32, #tpu.memory_space<vmem>>, %arg23: memref<32x128xf32, #tpu.memory_space<vmem>>, %arg24: memref<32x512xf32, #tpu.memory_space<vmem>>, %arg25: memref<32x128xf32, #tpu.memory_space<vmem>>) attributes {dimension_semantics = [#tpu.dimension_semantics<parallel>], iteration_bounds = array<i64: 1>, scalar_prefetch = 0 : i64, scratch_operands = 0 : i64, tpu.core_type = #tpu.core_type<tc>, window_params = [{transform_indices = @transform_0, window_bounds = array<i64: 32, 64>}, {pipeline_mode = #tpu.pipeline_mode<synchronous>, transform_indices = @transform_1, window_bounds = array<i64: 64, 64>}, {pipeline_mode = #tpu.pipeline_mode<synchronous>, transform_indices = @transform_2, window_bounds = array<i64: 1, 64>}, {pipeline_mode = #tpu.pipeline_mode<synchronous>, transform_indices = @transform_3, window_bounds = array<i64: 128, 64>}, {pipeline_mode = #tpu.pipeline_mode<synchronous>, transform_indices = @transform_4, window_bounds = array<i64: 1, 64>}, {pipeline_mode = #tpu.pipeline_mode<synchronous>, transform_indices = @transform_5, window_bounds = array<i64: 128, 64>}, {pipeline_mode = #tpu.pipeline_mode<synchronous>, transform_indices = @transform_6, window_bounds = array<i64: 1, 64>}, {pipeline_mode = #tpu.pipeline_mode<synchronous>, transform_indices = @transform_7, window_bounds = array<i64: 64, 128>}, {pipeline_mode = #tpu.pipeline_mode<synchronous>, transform_indices = @transform_8, window_bounds = array<i64: 1, 128>}, {pipeline_mode = #tpu.pipeline_mode<synchronous>, transform_indices = @transform_9, window_bounds = array<i64: 64, 128>}, {pipeline_mode = #tpu.pipeline_mode<synchronous>, transform_indices = @transform_10, window_bounds = array<i64: 128, 128>}, {pipeline_mode = #tpu.pipeline_mode<synchronous>, transform_indices = @transform_11, window_bounds = array<i64: 1, 128>}, {pipeline_mode = #tpu.pipeline_mode<synchronous>, transform_indices = @transform_12, window_bounds = array<i64: 64, 128>}, {pipeline_mode = #tpu.pipeline_mode<synchronous>, transform_indices = @transform_13, window_bounds = array<i64: 128, 128>}, {pipeline_mode = #tpu.pipeline_mode<synchronous>, transform_indices = @transform_14, window_bounds = array<i64: 1, 128>}, {pipeline_mode = #tpu.pipeline_mode<synchronous>, transform_indices = @transform_15, window_bounds = array<i64: 128, 16>}, {pipeline_mode = #tpu.pipeline_mode<synchronous>, transform_indices = @transform_16, window_bounds = array<i64: 1, 16>}, {pipeline_mode = #tpu.pipeline_mode<synchronous>, transform_indices = @transform_17, window_bounds = array<i64: 16, 16>}, {pipeline_mode = #tpu.pipeline_mode<synchronous>, transform_indices = @transform_18, window_bounds = array<i64: 128, 64>}, {pipeline_mode = #tpu.pipeline_mode<synchronous>, transform_indices = @transform_19, window_bounds = array<i64: 1, 64>}, {pipeline_mode = #tpu.pipeline_mode<synchronous>, transform_indices = @transform_20, window_bounds = array<i64: 16, 512>}, {pipeline_mode = #tpu.pipeline_mode<synchronous>, transform_indices = @transform_21, window_bounds = array<i64: 128, 512>}, {transform_indices = @transform_22, window_bounds = array<i64: 32, 128>}, {transform_indices = @transform_23, window_bounds = array<i64: 32, 512>}, {transform_indices = @transform_24, window_bounds = array<i64: 32, 128>}]} {
    %c0 = arith.constant 0 : index
    %c0_0 = arith.constant 0 : index
    %0 = vector.load %arg1[%c0, %c0_0] : memref<32x64xf32, #tpu.memory_space<vmem>>, vector<32x64xf32>
    %c0_1 = arith.constant 0 : index
    %c0_2 = arith.constant 0 : index
    %1 = vector.load %arg2[%c0_1, %c0_2] : memref<64x64xf32, #tpu.memory_space<vmem>>, vector<64x64xf32>
    %cst = arith.constant dense<0.000000e+00> : vector<32x64xf32>
    %2 = tpu.matmul %0, %1, %cst {dimension_numbers = #tpu.dot_dimension_numbers<[1], [0], [0], [1], [0, 0, 1, 1], [], []>} : vector<32x64xf32>, vector<64x64xf32>, vector<32x64xf32> -> vector<32x64xf32>
    %c0_3 = arith.constant 0 : index
    %c0_4 = arith.constant 0 : index
    %3 = vector.load %arg3[%c0_3, %c0_4] : memref<1x64xf32, #tpu.memory_space<vmem>>, vector<1x64xf32>
    %4 = vector.broadcast %3 : vector<1x64xf32> to vector<32x64xf32>
    %5 = arith.addf %2, %4 : vector<32x64xf32>
    %cst_5 = arith.constant 0.000000e+00 : f32
    %6 = vector.broadcast %cst_5 : f32 to vector<32x64xf32>
    %7 = arith.maximumf %5, %6 : vector<32x64xf32>
    %8 = tpu.concatenate %0, %7 in 1 : vector<32x64xf32>, vector<32x64xf32> -> vector<32x128xf32>
    %c0_6 = arith.constant 0 : index
    %c0_7 = arith.constant 0 : index
    %9 = vector.load %arg4[%c0_6, %c0_7] : memref<128x64xf32, #tpu.memory_space<vmem>>, vector<128x64xf32>
    %cst_8 = arith.constant dense<0.000000e+00> : vector<32x64xf32>
    %10 = tpu.matmul %8, %9, %cst_8 {dimension_numbers = #tpu.dot_dimension_numbers<[1], [0], [0], [1], [0, 0, 1, 1], [], []>} : vector<32x128xf32>, vector<128x64xf32>, vector<32x64xf32> -> vector<32x64xf32>
    %c0_9 = arith.constant 0 : index
    %c0_10 = arith.constant 0 : index
    %11 = vector.load %arg5[%c0_9, %c0_10] : memref<1x64xf32, #tpu.memory_space<vmem>>, vector<1x64xf32>
    %12 = vector.broadcast %11 : vector<1x64xf32> to vector<32x64xf32>
    %13 = arith.addf %10, %12 : vector<32x64xf32>
    %cst_11 = arith.constant 0.000000e+00 : f32
    %14 = vector.broadcast %cst_11 : f32 to vector<32x64xf32>
    %15 = arith.maximumf %13, %14 : vector<32x64xf32>
    %16 = tpu.concatenate %0, %15 in 1 : vector<32x64xf32>, vector<32x64xf32> -> vector<32x128xf32>
    %c0_12 = arith.constant 0 : index
    %c0_13 = arith.constant 0 : index
    %17 = vector.load %arg6[%c0_12, %c0_13] : memref<128x64xf32, #tpu.memory_space<vmem>>, vector<128x64xf32>
    %cst_14 = arith.constant dense<0.000000e+00> : vector<32x64xf32>
    %18 = tpu.matmul %16, %17, %cst_14 {dimension_numbers = #tpu.dot_dimension_numbers<[1], [0], [0], [1], [0, 0, 1, 1], [], []>} : vector<32x128xf32>, vector<128x64xf32>, vector<32x64xf32> -> vector<32x64xf32>
    %c0_15 = arith.constant 0 : index
    %c0_16 = arith.constant 0 : index
    %19 = vector.load %arg7[%c0_15, %c0_16] : memref<1x64xf32, #tpu.memory_space<vmem>>, vector<1x64xf32>
    %20 = vector.broadcast %19 : vector<1x64xf32> to vector<32x64xf32>
    %21 = arith.addf %18, %20 : vector<32x64xf32>
    %cst_17 = arith.constant 0.000000e+00 : f32
    %22 = vector.broadcast %cst_17 : f32 to vector<32x64xf32>
    %23 = arith.maximumf %21, %22 : vector<32x64xf32>
    %c0_18 = arith.constant 0 : index
    %c0_19 = arith.constant 0 : index
    %24 = vector.load %arg8[%c0_18, %c0_19] : memref<64x128xf32, #tpu.memory_space<vmem>>, vector<64x128xf32>
    %cst_20 = arith.constant dense<0.000000e+00> : vector<32x128xf32>
    %25 = tpu.matmul %23, %24, %cst_20 {dimension_numbers = #tpu.dot_dimension_numbers<[1], [0], [0], [1], [0, 0, 1, 1], [], []>} : vector<32x64xf32>, vector<64x128xf32>, vector<32x128xf32> -> vector<32x128xf32>
    %c0_21 = arith.constant 0 : index
    %c0_22 = arith.constant 0 : index
    %26 = vector.load %arg9[%c0_21, %c0_22] : memref<1x128xf32, #tpu.memory_space<vmem>>, vector<1x128xf32>
    %27 = vector.broadcast %26 : vector<1x128xf32> to vector<32x128xf32>
    %28 = arith.addf %25, %27 : vector<32x128xf32>
    %cst_23 = arith.constant 0.000000e+00 : f32
    %29 = vector.broadcast %cst_23 : f32 to vector<32x128xf32>
    %30 = arith.maximumf %28, %29 : vector<32x128xf32>
    %c0_24 = arith.constant 0 : index
    %c0_25 = arith.constant 0 : index
    %31 = vector.load %arg10[%c0_24, %c0_25] : memref<64x128xf32, #tpu.memory_space<vmem>>, vector<64x128xf32>
    %cst_26 = arith.constant dense<0.000000e+00> : vector<32x128xf32>
    %32 = tpu.matmul %23, %31, %cst_26 {dimension_numbers = #tpu.dot_dimension_numbers<[1], [0], [0], [1], [0, 0, 1, 1], [], []>} : vector<32x64xf32>, vector<64x128xf32>, vector<32x128xf32> -> vector<32x128xf32>
    %c0_27 = arith.constant 0 : index
    %c0_28 = arith.constant 0 : index
    %33 = vector.load %arg11[%c0_27, %c0_28] : memref<128x128xf32, #tpu.memory_space<vmem>>, vector<128x128xf32>
    %cst_29 = arith.constant dense<0.000000e+00> : vector<32x128xf32>
    %34 = tpu.matmul %30, %33, %cst_29 {dimension_numbers = #tpu.dot_dimension_numbers<[1], [0], [0], [1], [0, 0, 1, 1], [], []>} : vector<32x128xf32>, vector<128x128xf32>, vector<32x128xf32> -> vector<32x128xf32>
    %35 = arith.addf %32, %34 : vector<32x128xf32>
    %c0_30 = arith.constant 0 : index
    %c0_31 = arith.constant 0 : index
    %36 = vector.load %arg12[%c0_30, %c0_31] : memref<1x128xf32, #tpu.memory_space<vmem>>, vector<1x128xf32>
    %37 = vector.broadcast %36 : vector<1x128xf32> to vector<32x128xf32>
    %38 = arith.addf %35, %37 : vector<32x128xf32>
    %cst_32 = arith.constant 0.000000e+00 : f32
    %39 = vector.broadcast %cst_32 : f32 to vector<32x128xf32>
    %40 = arith.maximumf %38, %39 : vector<32x128xf32>
    %c0_33 = arith.constant 0 : index
    %c0_34 = arith.constant 0 : index
    %41 = vector.load %arg13[%c0_33, %c0_34] : memref<64x128xf32, #tpu.memory_space<vmem>>, vector<64x128xf32>
    %cst_35 = arith.constant dense<0.000000e+00> : vector<32x128xf32>
    %42 = tpu.matmul %23, %41, %cst_35 {dimension_numbers = #tpu.dot_dimension_numbers<[1], [0], [0], [1], [0, 0, 1, 1], [], []>} : vector<32x64xf32>, vector<64x128xf32>, vector<32x128xf32> -> vector<32x128xf32>
    %c0_36 = arith.constant 0 : index
    %c0_37 = arith.constant 0 : index
    %43 = vector.load %arg14[%c0_36, %c0_37] : memref<128x128xf32, #tpu.memory_space<vmem>>, vector<128x128xf32>
    %cst_38 = arith.constant dense<0.000000e+00> : vector<32x128xf32>
    %44 = tpu.matmul %40, %43, %cst_38 {dimension_numbers = #tpu.dot_dimension_numbers<[1], [0], [0], [1], [0, 0, 1, 1], [], []>} : vector<32x128xf32>, vector<128x128xf32>, vector<32x128xf32> -> vector<32x128xf32>
    %45 = arith.addf %42, %44 : vector<32x128xf32>
    %c0_39 = arith.constant 0 : index
    %c0_40 = arith.constant 0 : index
    %46 = vector.load %arg15[%c0_39, %c0_40] : memref<1x128xf32, #tpu.memory_space<vmem>>, vector<1x128xf32>
    %47 = vector.broadcast %46 : vector<1x128xf32> to vector<32x128xf32>
    %48 = arith.addf %45, %47 : vector<32x128xf32>
    %cst_41 = arith.constant 0.000000e+00 : f32
    %49 = vector.broadcast %cst_41 : f32 to vector<32x128xf32>
    %50 = arith.maximumf %48, %49 : vector<32x128xf32>
    %c0_42 = arith.constant 0 : index
    %c0_43 = arith.constant 0 : index
    %51 = vector.load %arg16[%c0_42, %c0_43] : memref<128x16xf32, #tpu.memory_space<vmem>>, vector<128x16xf32>
    %cst_44 = arith.constant dense<0.000000e+00> : vector<32x16xf32>
    %52 = tpu.matmul %50, %51, %cst_44 {dimension_numbers = #tpu.dot_dimension_numbers<[1], [0], [0], [1], [0, 0, 1, 1], [], []>} : vector<32x128xf32>, vector<128x16xf32>, vector<32x16xf32> -> vector<32x16xf32>
    %c0_45 = arith.constant 0 : index
    %c0_46 = arith.constant 0 : index
    %53 = vector.load %arg17[%c0_45, %c0_46] : memref<1x16xf32, #tpu.memory_space<vmem>>, vector<1x16xf32>
    %54 = vector.broadcast %53 : vector<1x16xf32> to vector<32x16xf32>
    %55 = arith.addf %52, %54 : vector<32x16xf32>
    %cst_47 = arith.constant dense<0xFF800000> : vector<32xf32>
    %56 = vector.multi_reduction <maximumf>, %55, %cst_47 [1] : vector<32x16xf32> to vector<32xf32>
    %57 = vector.shape_cast %56 : vector<32xf32> to vector<32x1xf32>
    %58 = vector.broadcast %57 : vector<32x1xf32> to vector<32x16xf32>
    %59 = arith.subf %55, %58 : vector<32x16xf32>
    %60 = math.exp %59 : vector<32x16xf32>
    %c0_48 = arith.constant 0 : index
    %c0_49 = arith.constant 0 : index
    %61 = vector.load %arg18[%c0_48, %c0_49] : memref<16x16xf32, #tpu.memory_space<vmem>>, vector<16x16xf32>
    %cst_50 = arith.constant dense<0.000000e+00> : vector<32x16xf32>
    %62 = tpu.matmul %60, %61, %cst_50 {dimension_numbers = #tpu.dot_dimension_numbers<[1], [0], [0], [1], [0, 0, 1, 1], [], []>} : vector<32x16xf32>, vector<16x16xf32>, vector<32x16xf32> -> vector<32x16xf32>
    %63 = tpu.reciprocal %62 : vector<32x16xf32> -> vector<32x16xf32>
    %64 = arith.mulf %60, %63 : vector<32x16xf32>
    %c0_51 = arith.constant 0 : index
    %c0_52 = arith.constant 0 : index
    %65 = vector.load %arg19[%c0_51, %c0_52] : memref<128x64xf32, #tpu.memory_space<vmem>>, vector<128x64xf32>
    %cst_53 = arith.constant dense<0.000000e+00> : vector<32x64xf32>
    %66 = tpu.matmul %50, %65, %cst_53 {dimension_numbers = #tpu.dot_dimension_numbers<[1], [0], [0], [1], [0, 0, 1, 1], [], []>} : vector<32x128xf32>, vector<128x64xf32>, vector<32x64xf32> -> vector<32x64xf32>
    %c0_54 = arith.constant 0 : index
    %c0_55 = arith.constant 0 : index
    %67 = vector.load %arg20[%c0_54, %c0_55] : memref<1x64xf32, #tpu.memory_space<vmem>>, vector<1x64xf32>
    %68 = vector.broadcast %67 : vector<1x64xf32> to vector<32x64xf32>
    %69 = arith.addf %66, %68 : vector<32x64xf32>
    %70 = arith.subf %69, %0 : vector<32x64xf32>
    %71 = arith.mulf %70, %70 : vector<32x64xf32>
    %cst_56 = arith.constant dense<0.000000e+00> : vector<32xf32>
    %72 = vector.multi_reduction <add>, %71, %cst_56 [1] : vector<32x64xf32> to vector<32xf32>
    %73 = vector.shape_cast %72 : vector<32xf32> to vector<32x1xf32>
    %c0_57 = arith.constant 0 : index
    %c0_58 = arith.constant 0 : index
    %74 = vector.load %arg21[%c0_57, %c0_58] : memref<16x512xf32, #tpu.memory_space<vmem>>, vector<16x512xf32>
    %cst_59 = arith.constant dense<0.000000e+00> : vector<32x512xf32>
    %75 = tpu.matmul %64, %74, %cst_59 {dimension_numbers = #tpu.dot_dimension_numbers<[1], [0], [0], [1], [0, 0, 1, 1], [], []>} : vector<32x16xf32>, vector<16x512xf32>, vector<32x512xf32> -> vector<32x512xf32>
    %c0_60 = arith.constant 0 : index
    %c0_61 = arith.constant 0 : index
    %76 = vector.load %arg22[%c0_60, %c0_61] : memref<128x512xf32, #tpu.memory_space<vmem>>, vector<128x512xf32>
    %cst_62 = arith.constant dense<0.000000e+00> : vector<32x512xf32>
    %77 = tpu.matmul %50, %76, %cst_62 {dimension_numbers = #tpu.dot_dimension_numbers<[1], [0], [0], [1], [0, 0, 1, 1], [], []>} : vector<32x128xf32>, vector<128x512xf32>, vector<32x512xf32> -> vector<32x512xf32>
    %78 = arith.mulf %75, %77 : vector<32x512xf32>
    %c0_63 = arith.constant 0 : index
    %c0_64 = arith.constant 0 : index
    %79 = vector.load %arg24[%c0_63, %c0_64] : memref<32x512xf32, #tpu.memory_space<vmem>>, vector<32x512xf32>
    tpu.vector_store %arg24[%c0_63, %c0_64], %78 {strides = array<i32>} : memref<32x512xf32, #tpu.memory_space<vmem>>, vector<32x512xf32>,
    %c0_65 = arith.constant 0 : index
    %c0_66 = arith.constant 0 : index
    %80 = vector.load %arg23[%c0_65, %c0_66] : memref<32x128xf32, #tpu.memory_space<vmem>>, vector<32x128xf32>
    tpu.vector_store %arg23[%c0_65, %c0_66], %50 {strides = array<i32>} : memref<32x128xf32, #tpu.memory_space<vmem>>, vector<32x128xf32>,
    %cst_67 = arith.constant 0.000000e+00 : f32
    %81 = vector.broadcast %cst_67 : f32 to vector<32x111xf32>
    %82 = tpu.concatenate %64, %73, %81 in 1 : vector<32x16xf32>, vector<32x1xf32>, vector<32x111xf32> -> vector<32x128xf32>
    %c0_68 = arith.constant 0 : index
    %c0_69 = arith.constant 0 : index
    %83 = vector.load %arg25[%c0_68, %c0_69] : memref<32x128xf32, #tpu.memory_space<vmem>>, vector<32x128xf32>
    tpu.vector_store %arg25[%c0_68, %c0_69], %82 {strides = array<i32>} : memref<32x128xf32, #tpu.memory_space<vmem>>, vector<32x128xf32>,
    return
  }
  func.func @transform_0(%arg0: i32) -> (i32, i32) {
    %c0_i32 = arith.constant 0 : i32
    %c0_i32_0 = arith.constant 0 : i32
    return %arg0, %c0_i32 : i32, i32
  }
  func.func @transform_1(%arg0: i32) -> (i32, i32) {
    %c0_i32 = arith.constant 0 : i32
    %c0_i32_0 = arith.constant 0 : i32
    %c0_i32_1 = arith.constant 0 : i32
    return %c0_i32, %c0_i32_0 : i32, i32
  }
  func.func @transform_2(%arg0: i32) -> (i32, i32) {
    %c0_i32 = arith.constant 0 : i32
    %c0_i32_0 = arith.constant 0 : i32
    %c0_i32_1 = arith.constant 0 : i32
    return %c0_i32, %c0_i32_0 : i32, i32
  }
  func.func @transform_3(%arg0: i32) -> (i32, i32) {
    %c0_i32 = arith.constant 0 : i32
    %c0_i32_0 = arith.constant 0 : i32
    %c0_i32_1 = arith.constant 0 : i32
    return %c0_i32, %c0_i32_0 : i32, i32
  }
  func.func @transform_4(%arg0: i32) -> (i32, i32) {
    %c0_i32 = arith.constant 0 : i32
    %c0_i32_0 = arith.constant 0 : i32
    %c0_i32_1 = arith.constant 0 : i32
    return %c0_i32, %c0_i32_0 : i32, i32
  }
  func.func @transform_5(%arg0: i32) -> (i32, i32) {
    %c0_i32 = arith.constant 0 : i32
    %c0_i32_0 = arith.constant 0 : i32
    %c0_i32_1 = arith.constant 0 : i32
    return %c0_i32, %c0_i32_0 : i32, i32
  }
  func.func @transform_6(%arg0: i32) -> (i32, i32) {
    %c0_i32 = arith.constant 0 : i32
    %c0_i32_0 = arith.constant 0 : i32
    %c0_i32_1 = arith.constant 0 : i32
    return %c0_i32, %c0_i32_0 : i32, i32
  }
  func.func @transform_7(%arg0: i32) -> (i32, i32) {
    %c0_i32 = arith.constant 0 : i32
    %c0_i32_0 = arith.constant 0 : i32
    %c0_i32_1 = arith.constant 0 : i32
    return %c0_i32, %c0_i32_0 : i32, i32
  }
  func.func @transform_8(%arg0: i32) -> (i32, i32) {
    %c0_i32 = arith.constant 0 : i32
    %c0_i32_0 = arith.constant 0 : i32
    %c0_i32_1 = arith.constant 0 : i32
    return %c0_i32, %c0_i32_0 : i32, i32
  }
  func.func @transform_9(%arg0: i32) -> (i32, i32) {
    %c0_i32 = arith.constant 0 : i32
    %c0_i32_0 = arith.constant 0 : i32
    %c0_i32_1 = arith.constant 0 : i32
    return %c0_i32, %c0_i32_0 : i32, i32
  }
  func.func @transform_10(%arg0: i32) -> (i32, i32) {
    %c0_i32 = arith.constant 0 : i32
    %c0_i32_0 = arith.constant 0 : i32
    %c0_i32_1 = arith.constant 0 : i32
    return %c0_i32, %c0_i32_0 : i32, i32
  }
  func.func @transform_11(%arg0: i32) -> (i32, i32) {
    %c0_i32 = arith.constant 0 : i32
    %c0_i32_0 = arith.constant 0 : i32
    %c0_i32_1 = arith.constant 0 : i32
    return %c0_i32, %c0_i32_0 : i32, i32
  }
  func.func @transform_12(%arg0: i32) -> (i32, i32) {
    %c0_i32 = arith.constant 0 : i32
    %c0_i32_0 = arith.constant 0 : i32
    %c0_i32_1 = arith.constant 0 : i32
    return %c0_i32, %c0_i32_0 : i32, i32
  }
  func.func @transform_13(%arg0: i32) -> (i32, i32) {
    %c0_i32 = arith.constant 0 : i32
    %c0_i32_0 = arith.constant 0 : i32
    %c0_i32_1 = arith.constant 0 : i32
    return %c0_i32, %c0_i32_0 : i32, i32
  }
  func.func @transform_14(%arg0: i32) -> (i32, i32) {
    %c0_i32 = arith.constant 0 : i32
    %c0_i32_0 = arith.constant 0 : i32
    %c0_i32_1 = arith.constant 0 : i32
    return %c0_i32, %c0_i32_0 : i32, i32
  }
  func.func @transform_15(%arg0: i32) -> (i32, i32) {
    %c0_i32 = arith.constant 0 : i32
    %c0_i32_0 = arith.constant 0 : i32
    %c0_i32_1 = arith.constant 0 : i32
    return %c0_i32, %c0_i32_0 : i32, i32
  }
  func.func @transform_16(%arg0: i32) -> (i32, i32) {
    %c0_i32 = arith.constant 0 : i32
    %c0_i32_0 = arith.constant 0 : i32
    %c0_i32_1 = arith.constant 0 : i32
    return %c0_i32, %c0_i32_0 : i32, i32
  }
  func.func @transform_17(%arg0: i32) -> (i32, i32) {
    %c0_i32 = arith.constant 0 : i32
    %c0_i32_0 = arith.constant 0 : i32
    %c0_i32_1 = arith.constant 0 : i32
    return %c0_i32, %c0_i32_0 : i32, i32
  }
  func.func @transform_18(%arg0: i32) -> (i32, i32) {
    %c0_i32 = arith.constant 0 : i32
    %c0_i32_0 = arith.constant 0 : i32
    %c0_i32_1 = arith.constant 0 : i32
    return %c0_i32, %c0_i32_0 : i32, i32
  }
  func.func @transform_19(%arg0: i32) -> (i32, i32) {
    %c0_i32 = arith.constant 0 : i32
    %c0_i32_0 = arith.constant 0 : i32
    %c0_i32_1 = arith.constant 0 : i32
    return %c0_i32, %c0_i32_0 : i32, i32
  }
  func.func @transform_20(%arg0: i32) -> (i32, i32) {
    %c0_i32 = arith.constant 0 : i32
    %c0_i32_0 = arith.constant 0 : i32
    %c0_i32_1 = arith.constant 0 : i32
    return %c0_i32, %c0_i32_0 : i32, i32
  }
  func.func @transform_21(%arg0: i32) -> (i32, i32) {
    %c0_i32 = arith.constant 0 : i32
    %c0_i32_0 = arith.constant 0 : i32
    %c0_i32_1 = arith.constant 0 : i32
    return %c0_i32, %c0_i32_0 : i32, i32
  }
  func.func @transform_22(%arg0: i32) -> (i32, i32) {
    %c0_i32 = arith.constant 0 : i32
    %c0_i32_0 = arith.constant 0 : i32
    return %arg0, %c0_i32 : i32, i32
  }
  func.func @transform_23(%arg0: i32) -> (i32, i32) {
    %c0_i32 = arith.constant 0 : i32
    %c0_i32_0 = arith.constant 0 : i32
    return %arg0, %c0_i32 : i32, i32
  }
  func.func @transform_24(%arg0: i32) -> (i32, i32) {
    %c0_i32 = arith.constant 0 : i32
    %c0_i32_0 = arith.constant 0 : i32
    return %arg0, %c0_i32 : i32, i32
  }
}

</mosaic_0001>

<bundles_post_ra>
// kernel: tpu_custom_call.1
= control target key start
LH: loop header
LB: loop body
LE: loop exit
PB: predicated region body
PF: predicated region fallthrough
CT: control target
= control target key end

     0   :  { %s2382_s0 = inlined_call_operand.hbm [shape: f32[32,64], index: 0, kind: input, shape index: {}]   ;;  %s2383_s1 = inlined_call_operand.vmem [shape: f32[64,64], index: 1, kind: input, shape index: {}]   ;;  %s2384_s2 = inlined_call_operand.hbm [shape: f32[1,64], index: 2, kind: input, shape index: {}]   ;;  %s2385_s3 = inlined_call_operand.vmem [shape: f32[128,64], index: 3, kind: input, shape index: {}]   ;;  %s2386_s4 = inlined_call_operand.hbm [shape: f32[1,64], index: 4, kind: input, shape index: {}]   ;;  %s2387_s5 = inlined_call_operand.vmem [shape: f32[128,64], index: 5, kind: input, shape index: {}]   ;;  %s2388_s6 = inlined_call_operand.hbm [shape: f32[1,64], index: 6, kind: input, shape index: {}]   ;;  %s2389_s7 = inlined_call_operand.vmem [shape: f32[64,128], index: 7, kind: input, shape index: {}]   ;;  %s2390_s8 = inlined_call_operand.vmem [shape: f32[1,128], index: 8, kind: input, shape index: {}]   ;;  %s2391_s9 = inlined_call_operand.vmem [shape: f32[64,128], index: 9, kind: input, shape index: {}]   ;;  %s2392_s10 = inlined_call_operand.vmem [shape: f32[128,128], index: 10, kind: input, shape index: {}]   ;;  %s2393_s11 = inlined_call_operand.vmem [shape: f32[1,128], index: 11, kind: input, shape index: {}]   ;;  %s2394_s12 = inlined_call_operand.vmem [shape: f32[64,128], index: 12, kind: input, shape index: {}]   ;;  %s2395_s13 = inlined_call_operand.vmem [shape: f32[128,128], index: 13, kind: input, shape index: {}]   ;;  %s2396_s14 = inlined_call_operand.vmem [shape: f32[1,128], index: 14, kind: input, shape index: {}]   ;;  %s2397_s15 = inlined_call_operand.vmem [shape: f32[128,16], index: 15, kind: input, shape index: {}]   ;;  %s2398_s16 = inlined_call_operand.vmem [shape: f32[1,16], index: 16, kind: input, shape index: {}]   ;;  %s2399_s17 = inlined_call_operand.hbm [shape: f32[16,16], index: 17, kind: input, shape index: {}]   ;;  %s2400_s18 = inlined_call_operand.vmem [shape: f32[128,64], index: 18, kind: input, shape index: {}]   ;;  %s2401_s19 = inlined_call_operand.vmem [shape: f32[1,64], index: 19, kind: input, shape index: {}]   ;;  %s2402_s20 = inlined_call_operand.vmem [shape: f32[16,512], index: 20, kind: input, shape index: {}]   ;;  %s2403_s21 = inlined_call_operand.hbm [shape: f32[128,512], index: 21, kind: input, shape index: {}]   ;;  %s2404_s22 = inlined_call_operand.hbm [shape: f32[32,128], index: 22, kind: output, shape index: {0}]   ;;  %s2405_s23 = inlined_call_operand.hbm [shape: f32[32,512], index: 23, kind: output, shape index: {1}]   ;;  %s2406_s24 = inlined_call_operand.hbm [shape: f32[32,128], index: 24, kind: output, shape index: {2}]  }
   0x1   :  { %2411 = sst [smem:[#allocation23_spill]] %s2382_s0 }
   0x2   :  { %2412 = sst [smem:[#allocation24_spill]] %s2383_s1 }
   0x3   :  { %2413 = sst [smem:[#allocation25_spill]] %s2384_s2 }
   0x4   :  { %2414 = sst [smem:[#allocation26_spill]] %s2385_s3 }
   0x5   :  { %2415 = sst [smem:[#allocation27_spill]] %s2386_s4 }
   0x6   :  { %2416 = sst [smem:[#allocation28_spill]] %s2387_s5 }
   0x7   :  { %2417 = sst [smem:[#allocation29_spill]] %s2388_s6 }
   0x8   :  { %2418 = sst [smem:[#allocation30_spill]] %s2389_s7 }
   0x9   :  { %2419 = sst [smem:[#allocation31_spill]] %s2390_s8 }
   0xa   :  { %2420 = sst [smem:[#allocation32_spill]] %s2404_s22 }
   0xb   :  { %2421 = sst [smem:[#allocation33_spill]] %s2405_s23 }
   0xc   :  { %2422 = sst [smem:[#allocation34_spill]] %s2406_s24 }
   0xd   :  { %30 = vsyncpa [#allocation3], 0 }
   0xe   :  { %31 = vsyncpa [#allocation6], 0 }
   0xf   :  { %32 = vsyncpa [#allocation9], 0 }
  0x10   :  { %33 = vsyncpa [#allocation12], 0 }
  0x11   :  { %34 = vsyncpa [#allocation4], 0  ;;  %s2423_s27 = sld [smem:[#allocation25_spill]] }
  0x17   :  { %s56_s28 = sshll.u32 %s2423_s27, 4  ;;  %s57_s28 = int_to_ptr.hbm [resolvable:$true] %s56_s28 }
  0x18   :  { %35 = vsyncpa [#allocation15], 0  ;;  %s1603_s6 = smov [#allocation5]   ;;  %s2424_s7 = sld [smem:[#allocation29_spill]] }
  0x19   :  { %s58_s2 = sshll.u32 %s1603_s6, 4  ;;  %s1604_s3 = smov [#allocation8]   ;;  %s59_s2 = int_to_ptr.vmem [resolvable:$true] %s58_s2 }
  0x1a   :  { %61 = dma.hbm_to_vmem [thread:$0]  %s57_s28, 16, %s59_s2, [#allocation6]  }
  0x1b   :  { %s84_s25 = sshll.u32 %s1604_s3, 4  ;;  %s2425_s1 = sld [smem:[#allocation23_spill]]  ;;  %s85_s25 = int_to_ptr.vmem [resolvable:$true] %s84_s25 }
  0x1c   :  { %s1605_s5 = smov [#allocation2]   ;;  %s2426_s23 = sld [smem:[#allocation27_spill]] }
  0x1d   :  { %s42_s26 = sshll.u32 %s1605_s5, 4  ;;  %s1606_s29 = smov 128   ;;  %s43_s26 = int_to_ptr.vmem [resolvable:$true] %s42_s26 }
  0x1e   :  { %s82_s30 = sshll.u32 %s2424_s7, 4  ;;  %s1607_s0 = smov 8   ;;  %s83_s30 = int_to_ptr.hbm [resolvable:$true] %s82_s30 }
  0x1f   :  { %87 = dma.hbm_to_vmem [thread:$0]  %s83_s30, 16, %s85_s25, [#allocation9]  }
  0x20   :  { %s1608_s28 = smov [#allocation7]   ;;  %s112_s30 = sshll.u32 %s2399_s17, 4  ;;  %s113_s30 = int_to_ptr.hbm [resolvable:$true] %s112_s30 }
  0x21   :  { %s40_s24 = sshll.u32 %s2425_s1, 4  ;;  %s71_s2 = sshll.u32 %s1608_s28, 4  ;;  %s41_s24 = int_to_ptr.hbm [resolvable:$true] %s40_s24  ;;  %s72_s2 = int_to_ptr.vmem [resolvable:$true] %s71_s2 }
  0x22   :  { %s69_s22 = sshll.u32 %s2426_s23, 4  ;;  %s131_s23 = sshll.u32 %s2403_s21, 4  ;;  %s70_s22 = int_to_ptr.hbm [resolvable:$true] %s69_s22  ;;  %s132_s23 = int_to_ptr.hbm [resolvable:$true] %s131_s23 }
  0x23   :  { %48 = dma.hbm_to_vmem [thread:$0]  %s41_s24, 512, %s43_s26, [#allocation3], %s1606_s29, %s1606_s29, %s1607_s0  }
  0x24   :  { %74 = dma.hbm_to_vmem [thread:$0]  %s70_s22, 16, %s72_s2, [#allocation6]  }
  0x25   :  { %s1609_s4 = smov [#allocation10]   ;;  %s1610_s24 = smov [#allocation11]  }
  0x26   :  { %s114_s1 = sshll.u32 %s1609_s4, 4  ;;  %s133_s5 = sshll.u32 %s1610_s24, 4  ;;  %s115_s1 = int_to_ptr.vmem [resolvable:$true] %s114_s1  ;;  %s134_s5 = int_to_ptr.vmem [resolvable:$true] %s133_s5 }
  0x27   :  { %120 = dma.hbm_to_vmem [thread:$0]  %s113_s30, 256, %s115_s1, [#allocation9], %s1606_s29, %s1606_s29, %s1607_s0  }
  0x28   :  { %s1611_s26 = smov 512   ;;  %s1612_s17 = smov 32  }
  0x29   :  { %139 = dma.hbm_to_vmem [thread:$0]  %s132_s23, 8192, %s134_s5, [#allocation12], %s1611_s26, %s1611_s26, %s1612_s17  }
  0x2a   :  { %1591 = dma.done.wait [#allocation3], 512  }
  0x2b   :  { %1592 = vsyncadd [#allocation3], 4294966784 }
  0x2c   :  { %1593 = dma.done.wait [#allocation6], 32  }
  0x2d   :  { %1594 = vsyncadd [#allocation6], 4294967264 }
  0x2e   :  { %1595 = dma.done.wait [#allocation9], 272  }
  0x2f   :  { %1596 = vsyncadd [#allocation9], 4294967024 }
  0x30   :  { %1597 = dma.done.wait [#allocation12], 8192  }
  0x31   :  { %1598 = vsyncadd [#allocation12], 4294959104  ;;  %s2427_s27 = sld [smem:[#allocation24_spill]]  ;;  %v1793_v8 = vld [vmem:[#allocation2] sm:$0xff]  ;;  %vm180_vm0 = vcmask 523264   ;;  %v1797_v9 = vld [vmem:[#allocation2 + $0x8] sm:$0xff] }
  0x32   :  { %v1801_v10 = vld [vmem:[#allocation2 + $0x10] sm:$0xff]  ;;  %v1805_v11 = vld [vmem:[#allocation2 + $0x18] sm:$0xff]  ;;  %v1351_v12 = vld [vmem:[#allocation5] ss:$0 sm:$0xff]  ;;  %s2428_s6 = sld [smem:[#allocation26_spill]]  ;;  %s1613_s4 = smov 64  }
  0x33   :  { %v1352_v49 = vld [vmem:[#allocation7] ss:$0 sm:$0xff]  ;;  %s2429_s3 = sld [smem:[#allocation28_spill]]  ;;  %vm666_vm1 = vcmask 130048   ;;  %vm1219_vm6 = vcmask 138240   ;;  %s1615_s7 = smov [#allocation14]  }
  0x34   :  { %s2430_s1 = sld [smem:[#allocation30_spill]] }
  0x35   :  { %s2431_s25 = sld [smem:[#allocation31_spill]] }
  0x36   :  { %s2434_s28 = sld [smem:[#allocation32_spill]] }
  0x37   :  { %v175_v0 = vld [vmem:[%s2427_s27 + $0x38] sm:$0xff]  ;;  %v174_v1 = vld [vmem:[%s2427_s27 + $0x30] sm:$0xff]  ;;  %v173_v2 = vld [vmem:[%s2427_s27 + $0x28] sm:$0xff] }
  0x38   :  { %201 = vmatpush.msra.mxu0 %v175_v0  ;;  %v172_v3 = vld [vmem:[%s2427_s27 + $0x20] sm:$0xff]  ;;  %v171_v4 = vld [vmem:[%s2427_s27 + $0x18] sm:$0xff]  ;;  %v170_v5 = vld [vmem:[%s2427_s27 + $0x10] sm:$0xff] }
  0x39   :  { %v169_v6 = vld [vmem:[%s2427_s27 + $0x8] sm:$0xff]  ;;  %v168_v7 = vld [vmem:[%s2427_s27] sm:$0xff]  ;;  %v261_v13 = vld [vmem:[%s2428_s6 + $0x78] sm:$0xff] }
  0x3a   :  { %202 = vmatpush.msra.mxu0 %v174_v1  ;;  %v260_v14 = vld [vmem:[%s2428_s6 + $0x70] sm:$0xff]  ;;  %266 = vmatpush.msra.mxu1 %v261_v13  ;;  %v259_v15 = vld [vmem:[%s2428_s6 + $0x68] sm:$0xff]  ;;  %v258_v18 = vld [vmem:[%s2428_s6 + $0x60] sm:$0xff] }
  0x3b   :  { %v257_v20 = vld [vmem:[%s2428_s6 + $0x58] sm:$0xff]  ;;  %v256_v21 = vld [vmem:[%s2428_s6 + $0x50] sm:$0xff]  ;;  %v255_v22 = vld [vmem:[%s2428_s6 + $0x48] sm:$0xff] }
  0x3c   :  { %203 = vmatpush.msra.mxu0 %v173_v2  ;;  %267 = vmatpush.msra.mxu1 %v260_v14  ;;  %v254_v25 = vld [vmem:[%s2428_s6 + $0x40] sm:$0xff]  ;;  %v253_v27 = vld [vmem:[%s2428_s6 + $0x38] sm:$0xff]  ;;  %v252_v28 = vld [vmem:[%s2428_s6 + $0x30] sm:$0xff]  ;;  %s1234_s2 = sshll.u32 %s2434_s28, 4  ;;  %s1235_s2 = int_to_ptr.hbm [resolvable:$true] %s1234_s2 }
  0x3d   :  { %v251_v29 = vld [vmem:[%s2428_s6 + $0x28] sm:$0xff]  ;;  %v250_v32 = vld [vmem:[%s2428_s6 + $0x20] sm:$0xff]  ;;  %v249_v34 = vld [vmem:[%s2428_s6 + $0x18] sm:$0xff] }
  0x3e   :  { %204 = vmatpush.msra.mxu0 %v172_v3  ;;  %268 = vmatpush.msra.mxu1 %v259_v15  ;;  %v248_v35 = vld [vmem:[%s2428_s6 + $0x10] sm:$0xff]  ;;  %v247_v36 = vld [vmem:[%s2428_s6 + $0x8] sm:$0xff]  ;;  %v246_v40 = vld [vmem:[%s2428_s6] sm:$0xff] }
  0x3f   :  { %v334_v50 = vld [vmem:[%s2429_s3 + $0x78] sm:$0xff]  ;;  %v333_v51 = vld [vmem:[%s2429_s3 + $0x70] sm:$0xff]  ;;  %v332_v52 = vld [vmem:[%s2429_s3 + $0x68] sm:$0xff] }
  0x40   :  { %205 = vmatpush.msra.mxu0 %v171_v4  ;;  %269 = vmatpush.msra.mxu1 %v258_v18  ;;  %v331_v55 = vld [vmem:[%s2429_s3 + $0x60] sm:$0xff]  ;;  %v330_v57 = vld [vmem:[%s2429_s3 + $0x58] sm:$0xff]  ;;  %v329_v58 = vld [vmem:[%s2429_s3 + $0x50] sm:$0xff] }
  0x41   :  { %339 = vmatpush.msra.mxu2 %v334_v50  ;;  %v328_v59 = vld [vmem:[%s2429_s3 + $0x48] sm:$0xff]  ;;  %v327_v62 = vld [vmem:[%s2429_s3 + $0x40] sm:$0xff]  ;;  %v326_v0 = vld [vmem:[%s2429_s3 + $0x38] sm:$0xff] }
  0x42   :  { %206 = vmatpush.msra.mxu0 %v170_v5  ;;  %270 = vmatpush.msra.mxu1 %v257_v20  ;;  %v325_v1 = vld [vmem:[%s2429_s3 + $0x30] sm:$0xff]  ;;  %v324_v2 = vld [vmem:[%s2429_s3 + $0x28] sm:$0xff]  ;;  %v323_v5 = vld [vmem:[%s2429_s3 + $0x20] sm:$0xff] }
  0x43   :  { %340 = vmatpush.msra.mxu2 %v333_v51  ;;  %v320_v13 = vld [vmem:[%s2429_s3 + $0x8] sm:$0xff]  ;;  %v435_v50 = vld [vmem:[%s2391_s9 + $0x30] sm:$0xff] }
  0x44   :  { %207 = vmatpush.msra.mxu0 %v169_v6  ;;  %271 = vmatpush.msra.mxu1 %v256_v21  ;;  %v434_v51 = vld [vmem:[%s2391_s9 + $0x28] sm:$0xff] }
  0x45   :  { %341 = vmatpush.msra.mxu2 %v332_v52  ;;  %v433_v52 = vld [vmem:[%s2391_s9 + $0x20] sm:$0xff] }
  0x46   :  { %208 = vmatpush.msra.mxu0 %v168_v7  ;;  %272 = vmatpush.msra.mxu1 %v255_v22  ;;  %v322_v7 = vld [vmem:[%s2429_s3 + $0x18] sm:$0xff] }
  0x47   :  { %1285 = vmatmul.msk.f32.vlgmr.msra.gmra.mxu0 %vm180_vm0, %v1793_v8  ;;  %342 = vmatpush.msra.mxu2 %v331_v55  ;;  %v379_v22 = vld [vmem:[%s2430_s1 + $0x38] sm:$0xff]  ;;  %v430_v55 = vld [vmem:[%s2391_s9 + $0x8] sm:$0xff] }
  0x48   :  { %273 = vmatpush.msra.mxu1 %v254_v25  ;;  %404 = vmatpush.msra.mxu3 %v379_v22  ;;  %v529_v25 = vld [vmem:[%s2394_s12 + $0x30] sm:$0xff] }
  0x49   :  { %343 = vmatpush.msra.mxu2 %v330_v57 }
  0x4a   :  { %274 = vmatpush.msra.mxu1 %v253_v27  ;;  %v528_v27 = vld [vmem:[%s2394_s12 + $0x28] sm:$0xff] }
  0x4b   :  { %344 = vmatpush.msra.mxu2 %v329_v58 }
  0x4c   :  { %275 = vmatpush.msra.mxu1 %v252_v28  ;;  %v376_v28 = vld [vmem:[%s2430_s1 + $0x20] sm:$0xff] }
  0x4d   :  { %345 = vmatpush.msra.mxu2 %v328_v59 }
  0x4e   :  { %276 = vmatpush.msra.mxu1 %v251_v29  ;;  %v527_v29 = vld [vmem:[%s2394_s12 + $0x20] sm:$0xff] }
  0x4f   :  { %1286 = vmatmul.msk.f32.gmra.mxu0 %vm180_vm0, %v1797_v9  ;;  %346 = vmatpush.msra.mxu2 %v327_v62 }
  0x50   :  { %277 = vmatpush.msra.mxu1 %v250_v32 }
  0x51   :  { %347 = vmatpush.msra.mxu2 %v326_v0  ;;  %v451_v0 = vld [vmem:[%s2392_s10 + $0x70] sm:$0xff] }
  0x52   :  { %278 = vmatpush.msra.mxu1 %v249_v34 }
  0x53   :  { %348 = vmatpush.msra.mxu2 %v325_v1  ;;  %v450_v1 = vld [vmem:[%s2392_s10 + $0x68] sm:$0xff] }
  0x54   :  { %279 = vmatpush.msra.mxu1 %v248_v35 }
  0x55   :  { %349 = vmatpush.msra.mxu2 %v324_v2  ;;  %v449_v2 = vld [vmem:[%s2392_s10 + $0x60] sm:$0xff] }
  0x56   :  { %280 = vmatpush.msra.mxu1 %v247_v36  ;;  %v374_v36 = vld [vmem:[%s2430_s1 + $0x10] sm:$0xff] }
  0x57   :  { %1287 = vmatmul.msk.f32.gmra.mxu0 %vm180_vm0, %v1801_v10  ;;  %350 = vmatpush.msra.mxu2 %v323_v5  ;;  %v446_v5 = vld [vmem:[%s2392_s10 + $0x48] sm:$0xff] }
  0x58   :  { %281 = vmatpush.msra.mxu1 %v246_v40  ;;  %v372_v40 = vld [vmem:[%s2430_s1] sm:$0xff] }
  0x59   :  { %351 = vmatpush.msra.mxu2 %v322_v7  ;;  %v444_v7 = vld [vmem:[%s2392_s10 + $0x38] sm:$0xff] }
  0x5f   :  { %1288 = vmatmul.msk.f32.gmra.mxu0 %vm180_vm0, %v1805_v11 }
  0xc4   :  { %v210_v16 = vpop.f32.mrf.mxu0 }
  0xc5   :  { %v211_v17 = vadd.f32 %v1351_v12, %v210_v16 }
  0xc7   :  { %v222_v19 = vmax.f32 %v211_v17, 0.0  ;;  %v319_v17 = vld [vmem:[%s2429_s3] sm:$0xff] }
  0xc9   :  { %230 = vrot.lane.b32.xlu0 %v222_v19, %s1613_s4 }
  0xcc   :  { %v213_v23 = vpop.f32.mrf.mxu0 }
  0xcd   :  { %v214_v24 = vadd.f32 %v1351_v12, %v213_v23  ;;  %v530_v23 = vld [vmem:[%s2394_s12 + $0x38] sm:$0xff] }
  0xcf   :  { %v223_v26 = vmax.f32 %v214_v24, 0.0  ;;  %v378_v24 = vld [vmem:[%s2430_s1 + $0x30] sm:$0xff] }
  0xd0   :  { %405 = vmatpush.msra.mxu3 %v378_v24 }
  0xd1   :  { %232 = vrot.lane.b32.xlu0 %v223_v26, %s1613_s4  ;;  %v377_v26 = vld [vmem:[%s2430_s1 + $0x28] sm:$0xff] }
  0xd2   :  { %406 = vmatpush.msra.mxu3 %v377_v26 }
  0xd4   :  { %v216_v30 = vpop.f32.mrf.mxu0  ;;  %407 = vmatpush.msra.mxu3 %v376_v28 }
  0xd5   :  { %v217_v31 = vadd.f32 %v1351_v12, %v216_v30  ;;  %v375_v30 = vld [vmem:[%s2430_s1 + $0x18] sm:$0xff] }
  0xd6   :  { %408 = vmatpush.msra.mxu3 %v375_v30  ;;  %v546_v30 = vld [vmem:[%s2395_s13 + $0x78] sm:$0xff] }
  0xd7   :  { %v224_v33 = vmax.f32 %v217_v31, 0.0  ;;  %v526_v31 = vld [vmem:[%s2394_s12 + $0x18] sm:$0xff]  ;;  %547 = vmatpush.msrb.mxu1 %v546_v30 }
  0xd8   :  { %409 = vmatpush.msra.mxu3 %v374_v36  ;;  %v542_v36 = vld [vmem:[%s2395_s13 + $0x58] sm:$0xff] }
  0xd9   :  { %234 = vrot.lane.b32.xlu1 %v224_v33, %s1613_s4 }
  0xdc   :  { %v219_v37 = vpop.f32.mrf.mxu0 }
  0xdd   :  { %v220_v38 = vadd.f32 %v1351_v12, %v219_v37  ;;  %v321_v12 = vld [vmem:[%s2429_s3 + $0x10] sm:$0xff] }
  0xde   :  { %352 = vmatpush.msra.mxu2 %v321_v12  ;;  %v525_v37 = vld [vmem:[%s2394_s12 + $0x10] sm:$0xff] }
  0xdf   :  { %v225_v39 = vmax.f32 %v220_v38, 0.0  ;;  %v373_v38 = vld [vmem:[%s2430_s1 + $0x8] sm:$0xff]  ;;  %v443_v12 = vld [vmem:[%s2392_s10 + $0x30] sm:$0xff] }
  0xe0   :  { %353 = vmatpush.msra.mxu2 %v320_v13  ;;  %410 = vmatpush.msra.mxu3 %v373_v38  ;;  %v442_v13 = vld [vmem:[%s2392_s10 + $0x28] sm:$0xff] }
  0xe1   :  { %236 = vrot.lane.b32.xlu1 %v225_v39, %s1613_s4  ;;  %v524_v39 = vld [vmem:[%s2394_s12 + $0x8] sm:$0xff] }
  0xe2   :  { %354 = vmatpush.msra.mxu2 %v319_v17  ;;  %411 = vmatpush.msra.mxu3 %v372_v40  ;;  %v438_v17 = vld [vmem:[%s2392_s10 + $0x8] sm:$0xff]  ;;  %v538_v40 = vld [vmem:[%s2395_s13 + $0x38] sm:$0xff] }
  0xe3   :  { %v540_v38 = vld [vmem:[%s2395_s13 + $0x48] sm:$0xff] }
  0xe4   :  { %584 = vmatpush.msrb.mxu2 %v530_v23 }
  0xe6   :  { %585 = vmatpush.msrb.mxu2 %v529_v25 }
  0xe8   :  { %586 = vmatpush.msrb.mxu2 %v528_v27 }
  0xea   :  { %587 = vmatpush.msrb.mxu2 %v527_v29 }
  0xec   :  { %588 = vmatpush.msrb.mxu2 %v526_v31  ;;  %v545_v31 = vld [vmem:[%s2395_s13 + $0x70] sm:$0xff] }
  0xed   :  { %548 = vmatpush.msrb.mxu1 %v545_v31 }
  0xee   :  { %589 = vmatpush.msrb.mxu2 %v525_v37  ;;  %v541_v37 = vld [vmem:[%s2395_s13 + $0x50] sm:$0xff] }
  0xf0   :  { %590 = vmatpush.msrb.mxu2 %v524_v39  ;;  %v539_v39 = vld [vmem:[%s2395_s13 + $0x40] sm:$0xff] }
 0x13b   :  { %v231_v41 = vpop.permute.xlu0 %230 }
 0x13c   :  { %v242_v42 = vsel %vm180_vm0, %v1793_v8, %v231_v41  ;;  %v523_v41 = vld [vmem:[%s2394_s12] sm:$0xff] }
 0x13d   :  { %282 = vmatmul.f32.vlgmr.msra.gmra.mxu1 %v242_v42  ;;  %591 = vmatpush.msrb.mxu2 %v523_v41  ;;  %v1353_v42 = vld [vmem:[#allocation8] ss:$0 sm:$0xff]  ;;  %v537_v41 = vld [vmem:[%s2395_s13 + $0x30] sm:$0xff] }
 0x143   :  { %v233_v43 = vpop.permute.xlu0 %232 }
 0x144   :  { %v243_v44 = vsel %vm180_vm0, %v1797_v9, %v233_v43 }
 0x145   :  { %285 = vmatmul.f32.gmra.mxu1 %v243_v44 }
 0x14b   :  { %v235_v45 = vpop.permute.xlu1 %234 }
 0x14c   :  { %v244_v46 = vsel %vm180_vm0, %v1801_v10, %v235_v45 }
 0x14d   :  { %288 = vmatmul.f32.gmra.mxu1 %v244_v46 }
 0x153   :  { %v237_v47 = vpop.permute.xlu1 %236 }
 0x154   :  { %v245_v48 = vsel %vm180_vm0, %v1805_v11, %v237_v47 }
 0x155   :  { %291 = vmatmul.f32.gmra.mxu1 %v245_v48 }
 0x1ba   :  { %v283_v53 = vpop.f32.mrf.mxu1 }
 0x1bb   :  { %v284_v54 = vadd.f32 %v1352_v49, %v283_v53  ;;  %v432_v53 = vld [vmem:[%s2391_s9 + $0x18] sm:$0xff] }
 0x1bd   :  { %v295_v56 = vmax.f32 %v284_v54, 0.0  ;;  %v431_v54 = vld [vmem:[%s2391_s9 + $0x10] sm:$0xff] }
 0x1bf   :  { %303 = vrot.lane.b32.xlu2 %v295_v56, %s1613_s4  ;;  %v429_v56 = vld [vmem:[%s2391_s9] sm:$0xff] }
 0x1c2   :  { %v286_v60 = vpop.f32.mrf.mxu1 }
 0x1c3   :  { %v287_v61 = vadd.f32 %v1352_v49, %v286_v60 }
 0x1c5   :  { %v296_v63 = vmax.f32 %v287_v61, 0.0 }
 0x1c7   :  { %305 = vrot.lane.b32.xlu2 %v296_v63, %s1613_s4  ;;  %v452_v63 = vld [vmem:[%s2392_s10 + $0x78] sm:$0xff] }
 0x1c8   :  { %453 = vmatpush.msrb.mxu0 %v452_v63  ;;  %v630_v63 = vld [vmem:[%s2397_s15 + $0x68] sm:$0xff] }
 0x1ca   :  { %v289_v3 = vpop.f32.mrf.mxu1  ;;  %454 = vmatpush.msrb.mxu0 %v451_v0  ;;  %v807_v0 = vld [vmem:[%s2400_s18 + $0x68] sm:$0xff] }
 0x1cb   :  { %v290_v4 = vadd.f32 %v1352_v49, %v289_v3  ;;  %v448_v3 = vld [vmem:[%s2392_s10 + $0x58] sm:$0xff] }
 0x1cc   :  { %455 = vmatpush.msrb.mxu0 %v450_v1  ;;  %v629_v1 = vld [vmem:[%s2397_s15 + $0x60] sm:$0xff] }
 0x1cd   :  { %v297_v6 = vmax.f32 %v290_v4, 0.0  ;;  %v447_v4 = vld [vmem:[%s2392_s10 + $0x50] sm:$0xff] }
 0x1ce   :  { %456 = vmatpush.msrb.mxu0 %v449_v2  ;;  %v806_v2 = vld [vmem:[%s2400_s18 + $0x60] sm:$0xff] }
 0x1cf   :  { %307 = vrot.lane.b32.xlu0 %v297_v6, %s1613_s4  ;;  %v445_v6 = vld [vmem:[%s2392_s10 + $0x40] sm:$0xff] }
 0x1d0   :  { %457 = vmatpush.msrb.mxu0 %v448_v3  ;;  %v628_v3 = vld [vmem:[%s2397_s15 + $0x58] sm:$0xff] }
 0x1d2   :  { %v292_v14 = vpop.f32.mrf.mxu1  ;;  %458 = vmatpush.msrb.mxu0 %v447_v4  ;;  %v805_v4 = vld [vmem:[%s2400_s18 + $0x58] sm:$0xff] }
 0x1d3   :  { %v293_v15 = vadd.f32 %v1352_v49, %v292_v14  ;;  %v436_v49 = vld [vmem:[%s2391_s9 + $0x38] sm:$0xff]  ;;  %v441_v14 = vld [vmem:[%s2392_s10 + $0x20] sm:$0xff] }
 0x1d4   :  { %490 = vmatpush.msrb.mxu3 %v436_v49  ;;  %459 = vmatpush.msrb.mxu0 %v446_v5  ;;  %v2115_v49 = vld [vmem:[%s2393_s11] ss:$0 sm:$0xff]  ;;  %v627_v5 = vld [vmem:[%s2397_s15 + $0x50] sm:$0xff]  ;;  %s2435_s11 = sld [smem:[#allocation33_spill]] }
 0x1d5   :  { %v298_v16 = vmax.f32 %v293_v15, 0.0  ;;  %v440_v15 = vld [vmem:[%s2392_s10 + $0x18] sm:$0xff] }
 0x1d6   :  { %491 = vmatpush.msrb.mxu3 %v435_v50  ;;  %460 = vmatpush.msrb.mxu0 %v445_v6  ;;  %v804_v6 = vld [vmem:[%s2400_s18 + $0x50] sm:$0xff] }
 0x1d7   :  { %309 = vrot.lane.b32.xlu1 %v298_v16, %s1613_s4  ;;  %v439_v16 = vld [vmem:[%s2392_s10 + $0x10] sm:$0xff] }
 0x1d8   :  { %492 = vmatpush.msrb.mxu3 %v434_v51  ;;  %461 = vmatpush.msrb.mxu0 %v444_v7  ;;  %v626_v7 = vld [vmem:[%s2397_s15 + $0x48] sm:$0xff] }
 0x1da   :  { %493 = vmatpush.msrb.mxu3 %v433_v52  ;;  %462 = vmatpush.msrb.mxu0 %v443_v12  ;;  %v803_v12 = vld [vmem:[%s2400_s18 + $0x48] sm:$0xff] }
 0x1dc   :  { %494 = vmatpush.msrb.mxu3 %v432_v53  ;;  %463 = vmatpush.msrb.mxu0 %v442_v13  ;;  %v625_v13 = vld [vmem:[%s2397_s15 + $0x40] sm:$0xff] }
 0x1de   :  { %495 = vmatpush.msrb.mxu3 %v431_v54  ;;  %464 = vmatpush.msrb.mxu0 %v441_v14  ;;  %v802_v14 = vld [vmem:[%s2400_s18 + $0x40] sm:$0xff] }
 0x1e0   :  { %496 = vmatpush.msrb.mxu3 %v430_v55  ;;  %465 = vmatpush.msrb.mxu0 %v440_v15  ;;  %v624_v15 = vld [vmem:[%s2397_s15 + $0x38] sm:$0xff] }
 0x1e2   :  { %497 = vmatpush.msrb.mxu3 %v429_v56  ;;  %466 = vmatpush.msrb.mxu0 %v439_v16  ;;  %v801_v16 = vld [vmem:[%s2400_s18 + $0x38] sm:$0xff] }
 0x1e4   :  { %467 = vmatpush.msrb.mxu0 %v438_v17 }
 0x219   :  { %v304_v18 = vpop.permute.xlu2 %303 }
 0x21a   :  { %v315_v19 = vsel %vm180_vm0, %v1793_v8, %v304_v18  ;;  %v437_v18 = vld [vmem:[%s2392_s10] sm:$0xff]  ;;  %s2436_s10 = sld [smem:[#allocation34_spill]] }
 0x21b   :  { %355 = vmatmul.f32.vlgmr.msra.gmra.mxu2 %v315_v19  ;;  %468 = vmatpush.msrb.mxu0 %v437_v18  ;;  %v1354_v19 = vld [vmem:[%s2431_s25] ss:$0 sm:$0xff]  ;;  %v623_v18 = vld [vmem:[%s2397_s15 + $0x30] sm:$0xff] }
 0x220   :  { %s1260_s23 = sshll.u32 %s2436_s10, 4  ;;  %s1261_s23 = int_to_ptr.hbm [resolvable:$true] %s1260_s23 }
 0x221   :  { %v306_v20 = vpop.permute.xlu2 %305 }
 0x222   :  { %v316_v21 = vsel %vm180_vm0, %v1797_v9, %v306_v20 }
 0x223   :  { %358 = vmatmul.f32.gmra.mxu2 %v316_v21 }
 0x241   :  { %v308_v32 = vpop.permute.xlu0 %307 }
 0x242   :  { %v317_v33 = vsel %vm180_vm0, %v1801_v10, %v308_v32 }
 0x243   :  { %361 = vmatmul.f32.gmra.mxu2 %v317_v33  ;;  %v544_v33 = vld [vmem:[%s2395_s13 + $0x68] sm:$0xff] }
 0x244   :  { %549 = vmatpush.msrb.mxu1 %v544_v33  ;;  %v620_v33 = vld [vmem:[%s2397_s15 + $0x18] sm:$0xff] }
 0x249   :  { %v310_v34 = vpop.permute.xlu1 %309 }
 0x24a   :  { %v318_v35 = vsel %vm180_vm0, %v1805_v11, %v310_v34 }
 0x24b   :  { %364 = vmatmul.f32.gmra.mxu2 %v318_v35  ;;  %v543_v35 = vld [vmem:[%s2395_s13 + $0x60] sm:$0xff] }
 0x24c   :  { %550 = vmatpush.msrb.mxu1 %v543_v35  ;;  %v619_v35 = vld [vmem:[%s2397_s15 + $0x10] sm:$0xff] }
 0x24e   :  { %551 = vmatpush.msrb.mxu1 %v542_v36  ;;  %v796_v36 = vld [vmem:[%s2400_s18 + $0x10] sm:$0xff] }
 0x250   :  { %552 = vmatpush.msrb.mxu1 %v541_v37  ;;  %v618_v37 = vld [vmem:[%s2397_s15 + $0x8] sm:$0xff] }
 0x252   :  { %553 = vmatpush.msrb.mxu1 %v540_v38  ;;  %v795_v38 = vld [vmem:[%s2400_s18 + $0x8] sm:$0xff] }
 0x254   :  { %554 = vmatpush.msrb.mxu1 %v539_v39  ;;  %v617_v39 = vld [vmem:[%s2397_s15] sm:$0xff] }
 0x256   :  { %555 = vmatpush.msrb.mxu1 %v538_v40  ;;  %v794_v40 = vld [vmem:[%s2400_s18] sm:$0xff] }
 0x258   :  { %556 = vmatpush.msrb.mxu1 %v537_v41 }
 0x29e   :  { %v356_v43 = vpop.f32.mrf.mxu2 }
 0x29f   :  { %v357_v44 = vadd.f32 %v1353_v42, %v356_v43  ;;  %v535_v43 = vld [vmem:[%s2395_s13 + $0x20] sm:$0xff] }
 0x2a1   :  { %v368_v45 = vmax.f32 %v357_v44, 0.0  ;;  %v534_v44 = vld [vmem:[%s2395_s13 + $0x18] sm:$0xff] }
 0x2a3   :  { %1289 = vmatmul.msk.f32.vlgmr.msra.gmra.mxu3 %vm180_vm0, %v368_v45  ;;  %1297 = vmatmul.msk.f32.vlgmr.msrb.gmra.mxu2 %vm180_vm0, %v368_v45 }
 0x2a6   :  { %v359_v46 = vpop.f32.mrf.mxu2 }
 0x2a7   :  { %v360_v47 = vadd.f32 %v1353_v42, %v359_v46  ;;  %v532_v46 = vld [vmem:[%s2395_s13 + $0x8] sm:$0xff] }
 0x2a9   :  { %v369_v48 = vmax.f32 %v360_v47, 0.0  ;;  %v531_v47 = vld [vmem:[%s2395_s13] sm:$0xff] }
 0x2ab   :  { %1290 = vmatmul.msk.f32.gmra.mxu3 %vm180_vm0, %v369_v48  ;;  %1298 = vmatmul.msk.f32.gmra.mxu2 %vm180_vm0, %v369_v48 }
 0x2c6   :  { %v362_v57 = vpop.f32.mrf.mxu2 }
 0x2c7   :  { %v363_v58 = vadd.f32 %v1353_v42, %v362_v57 }
 0x2c9   :  { %v370_v59 = vmax.f32 %v363_v58, 0.0 }
 0x2cb   :  { %1291 = vmatmul.msk.f32.gmra.mxu3 %vm180_vm0, %v370_v59  ;;  %1299 = vmatmul.msk.f32.gmra.mxu2 %vm180_vm0, %v370_v59 }
 0x2ce   :  { %v365_v60 = vpop.f32.mrf.mxu2 }
 0x2cf   :  { %v366_v61 = vadd.f32 %v1353_v42, %v365_v60  ;;  %v536_v42 = vld [vmem:[%s2395_s13 + $0x28] sm:$0xff]  ;;  %v809_v60 = vld [vmem:[%s2400_s18 + $0x78] sm:$0xff] }
 0x2d0   :  { %557 = vmatpush.msrb.mxu1 %v536_v42  ;;  %1321 = vmatpush.msra.mxu2 %v809_v60  ;;  %v1356_v42 = vld [vmem:[%s2396_s14] ss:$0 sm:$0xff]  ;;  %s1245_s14 = sshll.u32 %s1615_s7, 4  ;;  %s1246_s14 = int_to_ptr.vmem [resolvable:$true] %s1245_s14 }
 0x2d1   :  { %v371_v62 = vmax.f32 %v366_v61, 0.0  ;;  %v631_v61 = vld [vmem:[%s2397_s15 + $0x70] sm:$0xff] }
 0x2d2   :  { %558 = vmatpush.msrb.mxu1 %v535_v43 }
 0x2d3   :  { %1292 = vmatmul.msk.f32.gmra.mxu3 %vm180_vm0, %v371_v62  ;;  %1300 = vmatmul.msk.f32.gmra.mxu2 %vm180_vm0, %v371_v62 }
 0x2d4   :  { %559 = vmatpush.msrb.mxu1 %v534_v44 }
 0x2db   :  { %1293 = vmatmul.msk.f32.vlgmr.msrb.gmra.mxu3 %vm180_vm0, %v368_v45  ;;  %v533_v45 = vld [vmem:[%s2395_s13 + $0x10] sm:$0xff]  ;;  %s1614_s13 = smov [#allocation13]  }
 0x2dc   :  { %560 = vmatpush.msrb.mxu1 %v533_v45  ;;  %s1232_s6 = sshll.u32 %s1614_s13, 4  ;;  %s1233_s6 = int_to_ptr.vmem [resolvable:$true] %s1232_s6 }
 0x2de   :  { %561 = vmatpush.msrb.mxu1 %v532_v46 }
 0x2e0   :  { %562 = vmatpush.msrb.mxu1 %v531_v47 }
 0x2e2   :  { %814 = vmatpush.msra.mxu1 %v809_v60 }
 0x2e3   :  { %1294 = vmatmul.msk.f32.gmra.mxu3 %vm180_vm0, %v369_v48 }
 0x2eb   :  { %1295 = vmatmul.msk.f32.gmra.mxu3 %vm180_vm0, %v370_v59  ;;  %v632_v59 = vld [vmem:[%s2397_s15 + $0x78] sm:$0xff] }
 0x2ec   :  { %637 = vmatpush.msra.mxu0 %v632_v59 }
 0x2ee   :  { %638 = vmatpush.msra.mxu0 %v631_v61 }
 0x2f0   :  { %639 = vmatpush.msra.mxu0 %v630_v63 }
 0x2f2   :  { %640 = vmatpush.msra.mxu0 %v629_v1 }
 0x2f3   :  { %1296 = vmatmul.msk.f32.gmra.mxu3 %vm180_vm0, %v371_v62  ;;  %v808_v62 = vld [vmem:[%s2400_s18 + $0x70] sm:$0xff] }
 0x2f4   :  { %815 = vmatpush.msra.mxu1 %v808_v62  ;;  %1322 = vmatpush.msra.mxu2 %v808_v62  ;;  %v1357_v62 = vld [vmem:[%s2398_s16] ss:$0 sm:$0xff]  ;;  %s1247_s16 = sshll.u32 %s2435_s11, 4  ;;  %s1248_s16 = int_to_ptr.hbm [resolvable:$true] %s1247_s16 }
 0x2f5   :  { %641 = vmatpush.msra.mxu0 %v628_v3  ;;  %v1358_v3 = vld [vmem:[%s2401_s19] ss:$0 sm:$0xff]  ;;  %s1616_s19 = smov [#allocation16]  }
 0x2f6   :  { %816 = vmatpush.msra.mxu1 %v807_v0  ;;  %1323 = vmatpush.msra.mxu2 %v807_v0  ;;  %s1258_s30 = sshll.u32 %s1616_s19, 4  ;;  %s1259_s30 = int_to_ptr.vmem [resolvable:$true] %s1258_s30 }
 0x2f7   :  { %642 = vmatpush.msra.mxu0 %v627_v5 }
 0x2f8   :  { %817 = vmatpush.msra.mxu1 %v806_v2  ;;  %1324 = vmatpush.msra.mxu2 %v806_v2 }
 0x2f9   :  { %643 = vmatpush.msra.mxu0 %v626_v7 }
 0x2fa   :  { %818 = vmatpush.msra.mxu1 %v805_v4  ;;  %1325 = vmatpush.msra.mxu2 %v805_v4 }
 0x2fb   :  { %644 = vmatpush.msra.mxu0 %v625_v13 }
 0x2fc   :  { %819 = vmatpush.msra.mxu1 %v804_v6  ;;  %1326 = vmatpush.msra.mxu2 %v804_v6 }
 0x2fd   :  { %645 = vmatpush.msra.mxu0 %v624_v15 }
 0x2fe   :  { %820 = vmatpush.msra.mxu1 %v803_v12  ;;  %1327 = vmatpush.msra.mxu2 %v803_v12 }
 0x2ff   :  { %646 = vmatpush.msra.mxu0 %v623_v18 }
 0x300   :  { %821 = vmatpush.msra.mxu1 %v802_v14  ;;  %1328 = vmatpush.msra.mxu2 %v802_v14 }
 0x302   :  { %822 = vmatpush.msra.mxu1 %v801_v16  ;;  %1329 = vmatpush.msra.mxu2 %v801_v16 }
 0x326   :  { %v413_v20 = vpop.f32.mrf.mxu3  ;;  %v593_v41 = vpop.f32.mrf.mxu2 }
 0x327   :  { %v414_v21 = vadd.f32 %v1354_v19, %v413_v20 }
 0x329   :  { %v425_v22 = vmax.f32 %v414_v21, 0.0 }
 0x32b   :  { %469 = vmatmul.f32.vlgmr.msrb.gmra.mxu0 %v425_v22  ;;  %v622_v22 = vld [vmem:[%s2397_s15 + $0x28] sm:$0xff] }
 0x32c   :  { %647 = vmatpush.msra.mxu0 %v622_v22 }
 0x32e   :  { %v416_v23 = vpop.f32.mrf.mxu3  ;;  %v596_v47 = vpop.f32.mrf.mxu2 }
 0x32f   :  { %v417_v24 = vadd.f32 %v1354_v19, %v416_v23  ;;  %v799_v23 = vld [vmem:[%s2400_s18 + $0x28] sm:$0xff] }
 0x331   :  { %v426_v25 = vmax.f32 %v417_v24, 0.0 }
 0x333   :  { %472 = vmatmul.f32.gmra.mxu0 %v426_v25  ;;  %v621_v25 = vld [vmem:[%s2397_s15 + $0x20] sm:$0xff] }
 0x334   :  { %648 = vmatpush.msra.mxu0 %v621_v25 }
 0x336   :  { %649 = vmatpush.msra.mxu0 %v620_v33 }
 0x338   :  { %650 = vmatpush.msra.mxu0 %v619_v35 }
 0x33a   :  { %651 = vmatpush.msra.mxu0 %v618_v37 }
 0x33c   :  { %652 = vmatpush.msra.mxu0 %v617_v39 }
 0x34e   :  { %v419_v26 = vpop.f32.mrf.mxu3 }
 0x34f   :  { %v420_v27 = vadd.f32 %v1354_v19, %v419_v26  ;;  %v798_v26 = vld [vmem:[%s2400_s18 + $0x20] sm:$0xff] }
 0x351   :  { %v427_v28 = vmax.f32 %v420_v27, 0.0 }
 0x353   :  { %475 = vmatmul.f32.gmra.mxu0 %v427_v28 }
 0x356   :  { %v422_v29 = vpop.f32.mrf.mxu3 }
 0x357   :  { %v423_v32 = vadd.f32 %v1354_v19, %v422_v29  ;;  %v800_v19 = vld [vmem:[%s2400_s18 + $0x30] sm:$0xff] }
 0x358   :  { %823 = vmatpush.msra.mxu1 %v800_v19  ;;  %1330 = vmatpush.msra.mxu2 %v800_v19 }
 0x359   :  { %v428_v34 = vmax.f32 %v423_v32, 0.0 }
 0x35a   :  { %824 = vmatpush.msra.mxu1 %v799_v23  ;;  %1331 = vmatpush.msra.mxu2 %v799_v23 }
 0x35b   :  { %478 = vmatmul.f32.gmra.mxu0 %v428_v34  ;;  %v797_v34 = vld [vmem:[%s2400_s18 + $0x18] sm:$0xff] }
 0x35c   :  { %825 = vmatpush.msra.mxu1 %v798_v26  ;;  %1332 = vmatpush.msra.mxu2 %v798_v26 }
 0x35e   :  { %v499_v48 = vpop.f32.mrf.mxu3  ;;  %826 = vmatpush.msra.mxu1 %v797_v34  ;;  %1333 = vmatpush.msra.mxu2 %v797_v34  ;;  %v691_v34 = vld [vmem:[#allocation10] sm:$0xff] }
 0x360   :  { %827 = vmatpush.msra.mxu1 %v796_v36  ;;  %1334 = vmatpush.msra.mxu2 %v796_v36 }
 0x362   :  { %828 = vmatpush.msra.mxu1 %v795_v38  ;;  %1335 = vmatpush.msra.mxu2 %v795_v38 }
 0x364   :  { %829 = vmatpush.msra.mxu1 %v794_v40  ;;  %1336 = vmatpush.msra.mxu2 %v794_v40 }
 0x366   :  { %v502_v54 = vpop.f32.mrf.mxu3 }
 0x36e   :  { %v505_v17 = vpop.f32.mrf.mxu3 }
 0x376   :  { %v508_v28 = vpop.f32.mrf.mxu3 }
 0x3a8   :  { %v470_v50 = vpop.f32.mrf.mxu0 }
 0x3a9   :  { %v500_v51 = vadd.f32 %v499_v48, %v470_v50 }
 0x3ab   :  { %v515_v52 = vadd.f32 %v2115_v49, %v500_v51 }
 0x3ad   :  { %v519_v53 = vmax.f32 %v515_v52, 0.0  ;;  %v599_v52 = vpop.f32.mrf.mxu2 }
 0x3af   :  { %563 = vmatmul.f32.vlgmr.msrb.gmra.mxu1 %v519_v53 }
 0x3b0   :  { %v473_v55 = vpop.f32.mrf.mxu0 }
 0x3b1   :  { %v503_v56 = vadd.f32 %v502_v54, %v473_v55 }
 0x3b3   :  { %v516_v57 = vadd.f32 %v2115_v49, %v503_v56 }
 0x3b5   :  { %v520_v58 = vmax.f32 %v516_v57, 0.0  ;;  %v602_v57 = vpop.f32.mrf.mxu2 }
 0x3b7   :  { %566 = vmatmul.f32.gmra.mxu1 %v520_v58 }
 0x3d0   :  { %v476_v20 = vpop.f32.mrf.mxu0 }
 0x3d1   :  { %v506_v21 = vadd.f32 %v505_v17, %v476_v20 }
 0x3d3   :  { %v517_v24 = vadd.f32 %v2115_v49, %v506_v21 }
 0x3d5   :  { %v521_v27 = vmax.f32 %v517_v24, 0.0 }
 0x3d7   :  { %569 = vmatmul.f32.gmra.mxu1 %v521_v27 }
 0x3d8   :  { %v479_v29 = vpop.f32.mrf.mxu0 }
 0x3d9   :  { %v509_v30 = vadd.f32 %v508_v28, %v479_v29 }
 0x3db   :  { %v518_v31 = vadd.f32 %v2115_v49, %v509_v30 }
 0x3dd   :  { %v522_v32 = vmax.f32 %v518_v31, 0.0 }
 0x3df   :  { %572 = vmatmul.f32.gmra.mxu1 %v522_v32 }
 0x42c   :  { %v564_v43 = vpop.f32.mrf.mxu1 }
 0x42d   :  { %v594_v44 = vadd.f32 %v593_v41, %v564_v43 }
 0x42f   :  { %v609_v45 = vadd.f32 %v1356_v42, %v594_v44 }
 0x431   :  { %v2220_v46 = vmax.f32 %v609_v45, 0.0 }
 0x433   :  { %1211 = vst [vmem:[#allocation13] sm:$0xff] %v2220_v46  ;;  %653 = vmatmul.f32.vlgmr.msra.gmra.mxu0 %v2220_v46  ;;  %830 = vmatmul.f32.vlgmr.msra.gmra.mxu1 %v2220_v46 }
 0x434   :  { %v567_v48 = vpop.f32.mrf.mxu1 }
 0x435   :  { %v597_v49 = vadd.f32 %v596_v47, %v567_v48 }
 0x437   :  { %v610_v50 = vadd.f32 %v1356_v42, %v597_v49 }
 0x439   :  { %v2225_v51 = vmax.f32 %v610_v50, 0.0 }
 0x43b   :  { %1212 = vst [vmem:[#allocation13 + $0x8] sm:$0xff] %v2225_v51  ;;  %656 = vmatmul.f32.gmra.mxu0 %v2225_v51  ;;  %833 = vmatmul.f32.gmra.mxu1 %v2225_v51 }
 0x454   :  { %v570_v53 = vpop.f32.mrf.mxu1 }
 0x455   :  { %v600_v54 = vadd.f32 %v599_v52, %v570_v53  ;;  %v869_v52 = vld [vmem:[%s2402_s20 + $0x30] sm:$0xff]  ;;  %v867_v53 = vld [vmem:[%s2402_s20 + $0x20] sm:$0xff] }
 0x456   :  { %897 = vmatpush.msrb.mxu2 %v867_v53 }
 0x457   :  { %v611_v55 = vadd.f32 %v1356_v42, %v600_v54  ;;  %v868_v54 = vld [vmem:[%s2402_s20 + $0x28] sm:$0xff] }
 0x458   :  { %926 = vmatpush.msrb.mxu0 %v868_v54 }
 0x459   :  { %v2230_v56 = vmax.f32 %v611_v55, 0.0  ;;  %v870_v55 = vld [vmem:[%s2402_s20 + $0x38] sm:$0xff] }
 0x45a   :  { %984 = vmatpush.msrb.mxu1 %v870_v55 }
 0x45b   :  { %1213 = vst [vmem:[#allocation13 + $0x10] sm:$0xff] %v2230_v56  ;;  %659 = vmatmul.f32.gmra.mxu0 %v2230_v56  ;;  %836 = vmatmul.f32.vlgmr.msra.gmra.mxu2 %v2230_v56 }
 0x45c   :  { %v573_v58 = vpop.f32.mrf.mxu1 }
 0x45d   :  { %v603_v59 = vadd.f32 %v602_v57, %v573_v58  ;;  %v863_v57 = vld [vmem:[%s2402_s20] sm:$0xff]  ;;  %v864_v58 = vld [vmem:[%s2402_s20 + $0x8] sm:$0xff] }
 0x45e   :  { %898 = vmatpush.msrb.mxu2 %v863_v57  ;;  %927 = vmatpush.msrb.mxu0 %v864_v58  ;;  %v1035_v57 = vld [vmem:[#allocation11 + $0x120] sm:$0xff]  ;;  %v1037_v58 = vld [vmem:[#allocation11 + $0x130] sm:$0xff] }
 0x45f   :  { %v612_v60 = vadd.f32 %v1356_v42, %v603_v59  ;;  %v865_v59 = vld [vmem:[%s2402_s20 + $0x10] sm:$0xff] }
 0x461   :  { %v2235_v61 = vmax.f32 %v612_v60, 0.0  ;;  %v866_v60 = vld [vmem:[%s2402_s20 + $0x18] sm:$0xff] }
 0x462   :  { %985 = vmatpush.msrb.mxu1 %v866_v60  ;;  %v1038_v60 = vld [vmem:[#allocation11 + $0x138] sm:$0xff] }
 0x463   :  { %1214 = vst [vmem:[#allocation13 + $0x18] sm:$0xff] %v2235_v61  ;;  %662 = vmatmul.f32.gmra.mxu0 %v2235_v61  ;;  %839 = vmatmul.f32.gmra.mxu2 %v2235_v61 }
 0x464   :  { %1240 = dma.vmem_to_hbm [thread:$0]  %s1233_s6, 512, %s1235_s2, [#allocation4], %s1606_s29, %s1606_s29, %s1607_s0  }
 0x4b0   :  { %v654_v63 = vpop.f32.mrf.mxu0  ;;  %v831_v0 = vpop.f32.mrf.mxu1 }
 0x4b1   :  { %v655_v1 = vadd.f32 %v1357_v62, %v654_v63  ;;  %v832_v20 = vadd.f32 %v1358_v3, %v831_v0 }
 0x4b3   :  { %v667_v2 = vsel %vm666_vm1, %v655_v1, -inf }
 0x4b4   :  { %668 = vmax.xlane.f32.xlu2 %v667_v2 }
 0x4b8   :  { %v657_v4 = vpop.f32.mrf.mxu0  ;;  %v834_v5 = vpop.f32.mrf.mxu1 }
 0x4b9   :  { %v658_v6 = vadd.f32 %v1357_v62, %v657_v4  ;;  %v835_v7 = vadd.f32 %v1358_v3, %v834_v5 }
 0x4bb   :  { %v844_v12 = vsub.f32 %v835_v7, %v1797_v9  ;;  %v670_v13 = vsel %vm666_vm1, %v658_v6, -inf  ;;  %v843_v9 = vsub.f32 %v832_v20, %v1793_v8  ;;  %v692_v8 = vld [vmem:[#allocation10 + $0x8] sm:$0xff]  ;;  %v1061_v7 = vld [vmem:[#allocation11 + $0x1f0] sm:$0xff]  ;;  %v1056_v20 = vld [vmem:[#allocation11 + $0x1c8] sm:$0xff] }
 0x4bc   :  { %671 = vmax.xlane.f32.xlu0 %v670_v13  ;;  %719 = vmatpush.msra.mxu3 %v692_v8 }
 0x4bd   :  { %v848_v14 = vmul.f32 %v844_v12, %v844_v12  ;;  %v847_v30 = vmul.f32 %v843_v9, %v843_v9  ;;  %v1060_v12 = vld [vmem:[#allocation11 + $0x1e8] sm:$0xff]  ;;  %v1051_v9 = vld [vmem:[#allocation11 + $0x1a0] sm:$0xff] }
 0x4be   :  { %720 = vmatpush.msra.mxu3 %v691_v34  ;;  %1092 = vmatpush.msra.mxu0 %v1060_v12  ;;  %v1048_v34 = vld [vmem:[#allocation11 + $0x188] sm:$0xff]  ;;  %v1025_v12 = vld [vmem:[#allocation11 + $0xd0] sm:$0xff] }
 0x4bf   :  { %v854_v15 = vsel %vm180_vm0, %v848_v14, 0.0  ;;  %v851_v32 = vsel %vm180_vm0, %v847_v30, 0.0  ;;  %v1026_v14 = vld [vmem:[#allocation11 + $0xd8] sm:$0xff] }
 0x4c0   :  { %955 = vmatpush.msrb.mxu3 %v869_v52  ;;  %1093 = vmatpush.msra.mxu0 %v1056_v20  ;;  %v1042_v52 = vld [vmem:[#allocation11 + $0x158] sm:$0xff]  ;;  %v1017_v20 = vld [vmem:[#allocation11 + $0x90] sm:$0xff] }
 0x4c2   :  { %956 = vmatpush.msrb.mxu3 %v865_v59  ;;  %v1036_v59 = vld [vmem:[#allocation11 + $0x128] sm:$0xff] }
 0x4c4   :  { %855 = vadd.xlane.f32.xlu0 %v854_v15  ;;  %v1062_v15 = vld [vmem:[#allocation11 + $0x1f8] sm:$0xff] }
 0x4c5   :  { %1150 = vmatpush.msra.mxu1 %v1062_v15  ;;  %v1019_v15 = vld [vmem:[#allocation11 + $0xa0] sm:$0xff] }
 0x4d8   :  { %v660_v16 = vpop.f32.mrf.mxu0 }
 0x4d9   :  { %v661_v17 = vadd.f32 %v1357_v62, %v660_v16 }
 0x4db   :  { %v673_v18 = vsel %vm666_vm1, %v661_v17, -inf }
 0x4dc   :  { %674 = vmax.xlane.f32.xlu1 %v673_v18  ;;  %v1055_v18 = vld [vmem:[#allocation11 + $0x1c0] sm:$0xff] }
 0x4de   :  { %v837_v19 = vpop.f32.mrf.mxu2 }
 0x4df   :  { %v838_v21 = vadd.f32 %v1358_v3, %v837_v19  ;;  %v1057_v19 = vld [vmem:[#allocation11 + $0x1d0] sm:$0xff] }
 0x4e0   :  { %v663_v22 = vpop.f32.mrf.mxu0 }
 0x4e1   :  { %v845_v23 = vsub.f32 %v838_v21, %v1801_v10  ;;  %v664_v24 = vadd.f32 %v1357_v62, %v663_v22 }
 0x4e3   :  { %v676_v25 = vsel %vm666_vm1, %v664_v24, -inf  ;;  %v849_v26 = vmul.f32 %v845_v23, %v845_v23  ;;  %v1058_v23 = vld [vmem:[#allocation11 + $0x1d8] sm:$0xff] }
 0x4e4   :  { %677 = vmax.xlane.f32.xlu2 %v676_v25  ;;  %1151 = vmatpush.msra.mxu1 %v1058_v23  ;;  %v1053_v25 = vld [vmem:[#allocation11 + $0x1b0] sm:$0xff]  ;;  %v1011_v23 = vld [vmem:[#allocation11 + $0x60] sm:$0xff] }
 0x4e5   :  { %v857_v27 = vsel %vm180_vm0, %v849_v26, 0.0 }
 0x4e6   :  { %858 = vadd.xlane.f32.xlu1 %v857_v27  ;;  %v840_v28 = vpop.f32.mrf.mxu2 }
 0x4e7   :  { %v841_v29 = vadd.f32 %v1358_v3, %v840_v28  ;;  %v1052_v28 = vld [vmem:[#allocation11 + $0x1a8] sm:$0xff] }
 0x4e8   :  { %1094 = vmatpush.msra.mxu0 %v1052_v28  ;;  %v1009_v28 = vld [vmem:[#allocation11 + $0x50] sm:$0xff] }
 0x4e9   :  { %v846_v31 = vsub.f32 %v841_v29, %v1805_v11  ;;  %v1054_v29 = vld [vmem:[#allocation11 + $0x1b8] sm:$0xff] }
 0x4ea   :  { %1152 = vmatpush.msra.mxu1 %v1054_v29  ;;  %1095 = vmatpush.msra.mxu0 %v1048_v34  ;;  %v1008_v29 = vld [vmem:[#allocation11 + $0x48] sm:$0xff]  ;;  %v1001_v34 = vld [vmem:[#allocation11 + $0x10] sm:$0xff] }
 0x4eb   :  { %v850_v33 = vmul.f32 %v846_v31, %v846_v31 }
 0x4ec   :  { %852 = vadd.xlane.f32.xlu2 %v851_v32  ;;  %v1047_v32 = vld [vmem:[#allocation11 + $0x180] sm:$0xff] }
 0x4ed   :  { %v860_v10 = vsel %vm180_vm0, %v850_v33, 0.0  ;;  %v1049_v33 = vld [vmem:[#allocation11 + $0x190] sm:$0xff] }
 0x4f4   :  { %861 = vadd.xlane.f32.xlu2 %v860_v10 }
 0x527   :  { %v669_v35 = vpop.xlane.xlu2 %668 }
 0x528   :  { %v679_v36 = vsub.f32 %v655_v1, %v669_v35  ;;  %v1050_v35 = vld [vmem:[#allocation11 + $0x198] sm:$0xff] }
 0x529   :  { %1153 = vmatpush.msra.mxu1 %v1050_v35  ;;  %v1000_v35 = vld [vmem:[#allocation11 + $0x8] sm:$0xff] }
 0x52a   :  { %v683_v37 = vmul.f32 1.442695, %v679_v36 }
 0x52c   :  { %1359 = vpow2.f32 %v683_v37  ;;  %v1043_v37 = vld [vmem:[#allocation11 + $0x160] sm:$0xff] }
 0x52f   :  { %v672_v38 = vpop.xlane.xlu0 %671 }
 0x530   :  { %v680_v39 = vsub.f32 %v658_v6, %v672_v38  ;;  %v1059_v6 = vld [vmem:[#allocation11 + $0x1e0] sm:$0xff]  ;;  %v1045_v38 = vld [vmem:[#allocation11 + $0x170] sm:$0xff] }
 0x531   :  { %1063 = vmatpush.msra.mxu2 %v1059_v6  ;;  %v1030_v6 = vld [vmem:[#allocation11 + $0xf8] sm:$0xff] }
 0x532   :  { %v2258_v40 = vpop.eup %1359  ;;  %v685_v11 = vmul.f32 1.442695, %v680_v39 }
 0x533   :  { %1301 = vmatmul.msk.f32.vlgmr.msra.gmra.mxu3 %vm666_vm1, %v2258_v40  ;;  %1064 = vmatpush.msra.mxu2 %v1055_v18  ;;  %v1022_v18 = vld [vmem:[#allocation11 + $0xb8] sm:$0xff] }
 0x534   :  { %1361 = vpow2.f32 %v685_v11  ;;  %1121 = vmatpush.msra.mxu3 %v1061_v7  ;;  %v1044_v11 = vld [vmem:[#allocation11 + $0x168] sm:$0xff]  ;;  %v1023_v7 = vld [vmem:[#allocation11 + $0xc0] sm:$0xff] }
 0x535   :  { %1065 = vmatpush.msra.mxu2 %v1051_v9  ;;  %1096 = vmatpush.msra.mxu0 %v1044_v11 }
 0x536   :  { %1122 = vmatpush.msra.mxu3 %v1057_v19  ;;  %v1015_v19 = vld [vmem:[#allocation11 + $0x80] sm:$0xff] }
 0x537   :  { %1066 = vmatpush.msra.mxu2 %v1047_v32  ;;  %v856_v55 = vpop.xlane.xlu0 %855  ;;  %v1005_v32 = vld [vmem:[#allocation11 + $0x30] sm:$0xff] }
 0x538   :  { %1123 = vmatpush.msra.mxu3 %v1053_v25  ;;  %v1012_v25 = vld [vmem:[#allocation11 + $0x68] sm:$0xff] }
 0x539   :  { %1067 = vmatpush.msra.mxu2 %v1043_v37 }
 0x53a   :  { %v2262_v41 = vpop.eup %1361  ;;  %1124 = vmatpush.msra.mxu3 %v1049_v33  ;;  %v1004_v33 = vld [vmem:[#allocation11 + $0x28] sm:$0xff] }
 0x53b   :  { %1302 = vmatmul.msk.f32.gmra.mxu3 %vm666_vm1, %v2262_v41 }
 0x53c   :  { %1125 = vmatpush.msra.mxu3 %v1045_v38 }
 0x54f   :  { %v675_v42 = vpop.xlane.xlu1 %674 }
 0x550   :  { %v681_v43 = vsub.f32 %v661_v17, %v675_v42  ;;  %v1046_v42 = vld [vmem:[#allocation11 + $0x178] sm:$0xff] }
 0x551   :  { %1154 = vmatpush.msra.mxu1 %v1046_v42 }
 0x552   :  { %v687_v44 = vmul.f32 1.442695, %v681_v43 }
 0x553   :  { %1155 = vmatpush.msra.mxu1 %v1042_v52 }
 0x554   :  { %1363 = vpow2.f32 %v687_v44  ;;  %v1039_v44 = vld [vmem:[#allocation11 + $0x140] sm:$0xff] }
 0x555   :  { %1068 = vmatpush.msra.mxu2 %v1039_v44  ;;  %1156 = vmatpush.msra.mxu1 %v1038_v60 }
 0x557   :  { %v678_v45 = vpop.xlane.xlu2 %677  ;;  %1069 = vmatpush.msra.mxu2 %v1035_v57 }
 0x558   :  { %v682_v47 = vsub.f32 %v664_v24, %v678_v45  ;;  %v1041_v45 = vld [vmem:[#allocation11 + $0x150] sm:$0xff] }
 0x559   :  { %1126 = vmatpush.msra.mxu3 %v1041_v45  ;;  %v859_v57 = vpop.xlane.xlu1 %858 }
 0x55a   :  { %v2266_v48 = vpop.eup %1363  ;;  %v689_v49 = vmul.f32 1.442695, %v682_v47 }
 0x55b   :  { %1303 = vmatmul.msk.f32.gmra.mxu3 %vm666_vm1, %v2266_v48 }
 0x55c   :  { %1365 = vpow2.f32 %v689_v49  ;;  %v1040_v49 = vld [vmem:[#allocation11 + $0x148] sm:$0xff]  ;;  %1127 = vmatpush.msra.mxu3 %v1037_v58 }
 0x55d   :  { %1097 = vmatpush.msra.mxu0 %v1040_v49 }
 0x55f   :  { %v853_v30 = vpop.xlane.xlu2 %852  ;;  %1098 = vmatpush.msra.mxu0 %v1036_v59 }
 0x562   :  { %v2270_v50 = vpop.eup %1365 }
 0x563   :  { %1304 = vmatmul.msk.f32.gmra.mxu3 %vm666_vm1, %v2270_v50 }
 0x5b6   :  { %v722_v62 = vpop.f32.mrf.mxu3 }
 0x5b7   :  { %1367 = vrcp.f32 %v722_v62  ;;  %v745_v3 = vand.u32 2147483648, %v722_v62  ;;  %v743_v5 = vand.u32 2147483647, %v722_v62  ;;  %vm739_vm3 = vweird.f32 %v722_v62 }
 0x5b9   :  { %v746_v17 = vor.u32 1.1754944e-38, %v745_v3  ;;  %vm744_vm5 = vcmp.eq.f32.partialorder %v743_v5, 8.507059e+37  ;;  %v1027_v3 = vld [vmem:[#allocation11 + $0xe0] sm:$0xff]  ;;  %v1028_v5 = vld [vmem:[#allocation11 + $0xe8] sm:$0xff] }
 0x5bd   :  { %v1368_v63 = vpop.eup %1367 }
 0x5be   :  { %v735_v0 = vmul.f32 %v1368_v63, %v722_v62  ;;  %v2298_v1 = vpop.f32.mrf.mxu3  ;;  %vm740_vm2 = vweird.f32 %v1368_v63 }
 0x5bf   :  { %1369 = vrcp.f32 %v2298_v1  ;;  %vm2301_vm4 = vmor %vm739_vm3, %vm740_vm2  ;;  %v759_v31 = vand.u32 2147483648, %v2298_v1  ;;  %v757_v8 = vand.u32 2147483647, %v2298_v1  ;;  %vm753_vm8 = vweird.f32 %v2298_v1 }
 0x5c0   :  { %v736_v2 = vsub.f32 1.0, %v735_v0 }
 0x5c1   :  { %v760_v43 = vor.u32 1.1754944e-38, %v759_v31  ;;  %vm758_vm10 = vcmp.eq.f32.partialorder %v757_v8, 8.507059e+37  ;;  %v1003_v31 = vld [vmem:[#allocation11 + $0x20] sm:$0xff] }
 0x5c2   :  { %v737_v4 = vmul.f32 %v1368_v63, %v736_v2  ;;  %v1034_v2 = vld [vmem:[#allocation11 + $0x118] sm:$0xff]  ;;  %v999_v8 = vld [vmem:[#allocation11] sm:$0xff] }
 0x5c3   :  { %1157 = vmatpush.msra.mxu1 %v1034_v2 }
 0x5c4   :  { %v738_v13 = vadd.f32 %v1368_v63, %v737_v4  ;;  %v1029_v4 = vld [vmem:[#allocation11 + $0xf0] sm:$0xff] }
 0x5c5   :  { %v2305_v16 = vpop.eup %1369  ;;  %1158 = vmatpush.msra.mxu1 %v1030_v6 }
 0x5c6   :  { %v742_v21 = vsel %vm2301_vm4, %v1368_v63, %v738_v13  ;;  %v749_v22 = vmul.f32 %v2305_v16, %v2298_v1  ;;  %vm754_vm7 = vweird.f32 %v2305_v16  ;;  %v1033_v63 = vld [vmem:[#allocation11 + $0x110] sm:$0xff]  ;;  %v1032_v1 = vld [vmem:[#allocation11 + $0x108] sm:$0xff] }
 0x5c7   :  { %v747_v24 = vsel %vm744_vm5, %v746_v17, %v742_v21  ;;  %vm755_vm9 = vmor %vm753_vm8, %vm754_vm7  ;;  %1128 = vmatpush.msra.mxu3 %v1033_v63  ;;  %1099 = vmatpush.msra.mxu0 %v1032_v1  ;;  %v1024_v13 = vld [vmem:[#allocation11 + $0xc8] sm:$0xff] }
 0x5c8   :  { %v750_v26 = vsub.f32 1.0, %v749_v22  ;;  %v790_v27 = vmul.f32 %v2258_v40, %v747_v24  ;;  %v1020_v17 = vld [vmem:[#allocation11 + $0xa8] sm:$0xff]  ;;  %1159 = vmatpush.msra.mxu1 %v1026_v14  ;;  %v1018_v22 = vld [vmem:[#allocation11 + $0x98] sm:$0xff]  ;;  %v1013_v24 = vld [vmem:[#allocation11 + $0x70] sm:$0xff] }
 0x5c9   :  { %1129 = vmatpush.msra.mxu3 %v1029_v4  ;;  %1100 = vmatpush.msra.mxu0 %v1028_v5  ;;  %v1016_v21 = vld [vmem:[#allocation11 + $0x88] sm:$0xff] }
 0x5ca   :  { %v751_v10 = vmul.f32 %v2305_v16, %v750_v26  ;;  %1305 = vmatmul.msk.f32.vlgmr.msrb.gmra.mxu2 %vm666_vm1, %v790_v27  ;;  %1309 = vmatmul.msk.f32.vlgmr.msrb.gmra.mxu0 %vm666_vm1, %v790_v27  ;;  %v1215_v36 = vsel %vm666_vm1, %v790_v27, %v853_v30  ;;  %v1014_v26 = vld [vmem:[#allocation11 + $0x78] sm:$0xff] }
 0x5cb   :  { %1313 = vmatmul.msk.f32.vlgmr.msrb.gmra.mxu3 %vm666_vm1, %v790_v27  ;;  %1317 = vmatmul.msk.f32.vlgmr.msrb.gmra.mxu1 %vm666_vm1, %v790_v27  ;;  %v1220_v39 = vsel %vm1219_vm6, %v1215_v36, 0.0  ;;  %v1007_v27 = vld [vmem:[#allocation11 + $0x40] sm:$0xff]  ;;  %v1010_v30 = vld [vmem:[#allocation11 + $0x58] sm:$0xff] }
 0x5cc   :  { %v752_v40 = vadd.f32 %v2305_v16, %v751_v10  ;;  %1224 = vst [vmem:[#allocation16] sm:$0xff] %v1220_v39  ;;  %1130 = vmatpush.msra.mxu3 %v1025_v12  ;;  %1101 = vmatpush.msra.mxu0 %v1024_v13  ;;  %v1006_v10 = vld [vmem:[#allocation11 + $0x38] sm:$0xff] }
 0x5cd   :  { %1160 = vmatpush.msra.mxu1 %v1022_v18  ;;  %v1002_v36 = vld [vmem:[#allocation11 + $0x18] sm:$0xff] }
 0x5ce   :  { %v756_v47 = vsel %vm755_vm9, %v2305_v16, %v752_v40  ;;  %v1021_v16 = vld [vmem:[#allocation11 + $0xb0] sm:$0xff]  ;;  %1102 = vmatpush.msra.mxu0 %v1020_v17 }
 0x5cf   :  { %v761_v53 = vsel %vm758_vm10, %v760_v43, %v756_v47  ;;  %1131 = vmatpush.msra.mxu3 %v1021_v16  ;;  %1161 = vmatpush.msra.mxu1 %v1018_v22 }
 0x5d0   :  { %v791_v54 = vmul.f32 %v2262_v41, %v761_v53  ;;  %v1031_v41 = vld [vmem:[#allocation11 + $0x100] sm:$0xff]  ;;  %1103 = vmatpush.msra.mxu0 %v1016_v21 }
 0x5d1   :  { %1070 = vmatpush.msra.mxu2 %v1031_v41  ;;  %1132 = vmatpush.msra.mxu3 %v1017_v20 }
 0x5d2   :  { %1306 = vmatmul.msk.f32.gmra.mxu2 %vm666_vm1, %v791_v54  ;;  %1310 = vmatmul.msk.f32.gmra.mxu0 %vm666_vm1, %v791_v54  ;;  %v1216_v62 = vsel %vm666_vm1, %v791_v54, %v856_v55 }
 0x5d3   :  { %1314 = vmatmul.msk.f32.gmra.mxu3 %vm666_vm1, %v791_v54  ;;  %1318 = vmatmul.msk.f32.gmra.mxu1 %vm666_vm1, %v791_v54  ;;  %v1221_v0 = vsel %vm1219_vm6, %v1216_v62, 0.0 }
 0x5d4   :  { %1225 = vst [vmem:[#allocation16 + $0x8] sm:$0xff] %v1221_v0  ;;  %1071 = vmatpush.msra.mxu2 %v1027_v3  ;;  %1133 = vmatpush.msra.mxu3 %v1013_v24  ;;  %v862_v3 = vpop.xlane.xlu2 %861 }
 0x5d5   :  { %1104 = vmatpush.msra.mxu0 %v1012_v25  ;;  %1162 = vmatpush.msra.mxu1 %v1014_v26 }
 0x5d6   :  { %1072 = vmatpush.msra.mxu2 %v1023_v7  ;;  %1134 = vmatpush.msra.mxu3 %v1009_v28 }
 0x5d7   :  { %1105 = vmatpush.msra.mxu0 %v1008_v29  ;;  %1163 = vmatpush.msra.mxu1 %v1010_v30 }
 0x5d8   :  { %1073 = vmatpush.msra.mxu2 %v1019_v15  ;;  %1135 = vmatpush.msra.mxu3 %v1005_v32 }
 0x5d9   :  { %1106 = vmatpush.msra.mxu0 %v1004_v33  ;;  %1164 = vmatpush.msra.mxu1 %v1006_v10 }
 0x5da   :  { %1074 = vmatpush.msra.mxu2 %v1015_v19  ;;  %1136 = vmatpush.msra.mxu3 %v1001_v34 }
 0x5db   :  { %1107 = vmatpush.msra.mxu0 %v1000_v35  ;;  %1165 = vmatpush.msra.mxu1 %v1002_v36 }
 0x5dc   :  { %1075 = vmatpush.msra.mxu2 %v1011_v23 }
 0x5de   :  { %v728_v9 = vpop.f32.mrf.mxu3  ;;  %1076 = vmatpush.msra.mxu2 %v1007_v27 }
 0x5df   :  { %1371 = vrcp.f32 %v728_v9  ;;  %v773_v11 = vand.u32 2147483648, %v728_v9  ;;  %v771_v43 = vand.u32 2147483647, %v728_v9  ;;  %vm767_vm12 = vweird.f32 %v728_v9 }
 0x5e0   :  { %1077 = vmatpush.msra.mxu2 %v1003_v31 }
 0x5e1   :  { %v774_v47 = vor.u32 1.1754944e-38, %v773_v11  ;;  %vm772_vm14 = vcmp.eq.f32.partialorder %v771_v43, 8.507059e+37 }
 0x5e2   :  { %1078 = vmatpush.msra.mxu2 %v999_v8 }
 0x5e5   :  { %v1372_v37 = vpop.eup %1371 }
 0x5e6   :  { %v763_v38 = vmul.f32 %v1372_v37, %v728_v9  ;;  %v731_v39 = vpop.f32.mrf.mxu3  ;;  %vm768_vm11 = vweird.f32 %v1372_v37 }
 0x5e7   :  { %1373 = vrcp.f32 %v731_v39  ;;  %vm769_vm13 = vmor %vm767_vm12, %vm768_vm11  ;;  %v787_v58 = vand.u32 2147483648, %v731_v39  ;;  %v785_v60 = vand.u32 2147483647, %v731_v39  ;;  %vm781_vm0 = vweird.f32 %v731_v39 }
 0x5e8   :  { %v764_v40 = vsub.f32 1.0, %v763_v38 }
 0x5e9   :  { %vm786_vm3 = vcmp.eq.f32.partialorder %v785_v60, 8.507059e+37 }
 0x5ea   :  { %v765_v42 = vmul.f32 %v1372_v37, %v764_v40 }
 0x5ec   :  { %v766_v44 = vadd.f32 %v1372_v37, %v765_v42 }
 0x5ed   :  { %v1374_v45 = vpop.eup %1373 }
 0x5ee   :  { %v770_v49 = vsel %vm769_vm13, %v1372_v37, %v766_v44  ;;  %v777_v52 = vmul.f32 %v1374_v45, %v731_v39  ;;  %vm782_vm15 = vweird.f32 %v1374_v45 }
 0x5ef   :  { %v775_v53 = vsel %vm772_vm14, %v774_v47, %v770_v49  ;;  %vm783_vm2 = vmor %vm781_vm0, %vm782_vm15 }
 0x5f0   :  { %v778_v54 = vsub.f32 1.0, %v777_v52  ;;  %v792_v55 = vmul.f32 %v2266_v48, %v775_v53  ;;  %v788_v48 = vor.u32 1.1754944e-38, %v787_v58 }
 0x5f2   :  { %v779_v59 = vmul.f32 %v1374_v45, %v778_v54  ;;  %1307 = vmatmul.msk.f32.gmra.mxu2 %vm666_vm1, %v792_v55  ;;  %1311 = vmatmul.msk.f32.gmra.mxu0 %vm666_vm1, %v792_v55  ;;  %v1217_v62 = vsel %vm666_vm1, %v792_v55, %v859_v57 }
 0x5f3   :  { %1315 = vmatmul.msk.f32.gmra.mxu3 %vm666_vm1, %v792_v55  ;;  %1319 = vmatmul.msk.f32.gmra.mxu1 %vm666_vm1, %v792_v55  ;;  %v1222_v41 = vsel %vm1219_vm6, %v1217_v62, 0.0 }
 0x5f4   :  { %v780_v63 = vadd.f32 %v1374_v45, %v779_v59  ;;  %1226 = vst [vmem:[#allocation16 + $0x10] sm:$0xff] %v1222_v41 }
 0x5f6   :  { %v784_v0 = vsel %vm783_vm2, %v1374_v45, %v780_v63 }
 0x5f7   :  { %v789_v1 = vsel %vm786_vm3, %v788_v48, %v784_v0 }
 0x5f8   :  { %v793_v2 = vmul.f32 %v2270_v50, %v789_v1 }
 0x5fa   :  { %1308 = vmatmul.msk.f32.gmra.mxu2 %vm666_vm1, %v793_v2  ;;  %1312 = vmatmul.msk.f32.gmra.mxu0 %vm666_vm1, %v793_v2  ;;  %v1218_v4 = vsel %vm666_vm1, %v793_v2, %v862_v3 }
 0x5fb   :  { %1316 = vmatmul.msk.f32.gmra.mxu3 %vm666_vm1, %v793_v2  ;;  %1320 = vmatmul.msk.f32.gmra.mxu1 %vm666_vm1, %v793_v2  ;;  %v1223_v5 = vsel %vm1219_vm6, %v1218_v4, 0.0 }
 0x5fc   :  { %1227 = vst [vmem:[#allocation16 + $0x18] sm:$0xff] %v1223_v5 }
 0x602   :  { %1079 = vmatmul.f32.vlgmr.msra.gmra.mxu2 %v2220_v46  ;;  %1108 = vmatmul.f32.vlgmr.msra.gmra.mxu0 %v2220_v46 }
 0x603   :  { %1137 = vmatmul.f32.vlgmr.msra.gmra.mxu3 %v2220_v46  ;;  %1166 = vmatmul.f32.vlgmr.msra.gmra.mxu1 %v2220_v46 }
 0x60a   :  { %1082 = vmatmul.f32.gmra.mxu2 %v2225_v51  ;;  %1111 = vmatmul.f32.gmra.mxu0 %v2225_v51 }
 0x60b   :  { %1140 = vmatmul.f32.gmra.mxu3 %v2225_v51  ;;  %1169 = vmatmul.f32.gmra.mxu1 %v2225_v51 }
 0x612   :  { %1085 = vmatmul.f32.gmra.mxu2 %v2230_v56  ;;  %1114 = vmatmul.f32.gmra.mxu0 %v2230_v56 }
 0x613   :  { %1143 = vmatmul.f32.gmra.mxu3 %v2230_v56  ;;  %1172 = vmatmul.f32.gmra.mxu1 %v2230_v56 }
 0x61a   :  { %1088 = vmatmul.f32.gmra.mxu2 %v2235_v61  ;;  %1117 = vmatmul.f32.gmra.mxu0 %v2235_v61 }
 0x61b   :  { %1146 = vmatmul.f32.gmra.mxu3 %v2235_v61  ;;  %1175 = vmatmul.f32.gmra.mxu1 %v2235_v61 }
 0x647   :  { %v929_v46 = vpop.f32.mrf.mxu0 }
 0x648   :  { %v987_v51 = vpop.f32.mrf.mxu1 }
 0x64d   :  { %v900_v56 = vpop.f32.mrf.mxu2 }
 0x64e   :  { %v958_v50 = vpop.f32.mrf.mxu3 }
 0x64f   :  { %v932_v6 = vpop.f32.mrf.mxu0 }
 0x650   :  { %v990_v7 = vpop.f32.mrf.mxu1 }
 0x655   :  { %v903_v12 = vpop.f32.mrf.mxu2 }
 0x656   :  { %v961_v61 = vpop.f32.mrf.mxu3 }
 0x66f   :  { %v935_v13 = vpop.f32.mrf.mxu0 }
 0x670   :  { %v993_v14 = vpop.f32.mrf.mxu1 }
 0x675   :  { %v906_v15 = vpop.f32.mrf.mxu2 }
 0x676   :  { %v964_v16 = vpop.f32.mrf.mxu3 }
 0x677   :  { %v938_v17 = vpop.f32.mrf.mxu0 }
 0x678   :  { %v996_v18 = vpop.f32.mrf.mxu1 }
 0x67d   :  { %v909_v19 = vpop.f32.mrf.mxu2 }
 0x67e   :  { %v967_v20 = vpop.f32.mrf.mxu3 }
 0x67f   :  { %v1109_v21 = vpop.f32.mrf.mxu0 }
 0x680   :  { %v1180_v22 = vmul.f32 %v1109_v21, %v929_v46  ;;  %v1167_v23 = vpop.f32.mrf.mxu1 }
 0x681   :  { %v1182_v24 = vmul.f32 %v1167_v23, %v987_v51 }
 0x682   :  { %1196 = vst [vmem:[#allocation14 + $0x8] sm:$0xff] %v1180_v22 }
 0x683   :  { %1198 = vst [vmem:[#allocation14 + $0x18] sm:$0xff] %v1182_v24 }
 0x685   :  { %v1080_v9 = vpop.f32.mrf.mxu2 }
 0x686   :  { %v1179_v25 = vmul.f32 %v1080_v9, %v900_v56  ;;  %v1138_v26 = vpop.f32.mrf.mxu3 }
 0x687   :  { %v1181_v27 = vmul.f32 %v1138_v26, %v958_v50  ;;  %v1112_v28 = vpop.f32.mrf.mxu0 }
 0x688   :  { %1195 = vst [vmem:[#allocation14] sm:$0xff] %v1179_v25  ;;  %v1184_v29 = vmul.f32 %v1112_v28, %v932_v6  ;;  %v1170_v30 = vpop.f32.mrf.mxu1 }
 0x689   :  { %1197 = vst [vmem:[#allocation14 + $0x10] sm:$0xff] %v1181_v27  ;;  %v1186_v31 = vmul.f32 %v1170_v30, %v990_v7 }
 0x68a   :  { %1200 = vst [vmem:[#allocation14 + $0x28] sm:$0xff] %v1184_v29 }
 0x68b   :  { %1202 = vst [vmem:[#allocation14 + $0x38] sm:$0xff] %v1186_v31 }
 0x68d   :  { %v1083_v32 = vpop.f32.mrf.mxu2 }
 0x68e   :  { %v1183_v33 = vmul.f32 %v1083_v32, %v903_v12  ;;  %v1141_v10 = vpop.f32.mrf.mxu3 }
 0x68f   :  { %v1185_v8 = vmul.f32 %v1141_v10, %v961_v61  ;;  %v1115_v34 = vpop.f32.mrf.mxu0 }
 0x690   :  { %1199 = vst [vmem:[#allocation14 + $0x20] sm:$0xff] %v1183_v33  ;;  %v1188_v35 = vmul.f32 %v1115_v34, %v935_v13  ;;  %v1173_v36 = vpop.f32.mrf.mxu1 }
 0x691   :  { %1201 = vst [vmem:[#allocation14 + $0x30] sm:$0xff] %v1185_v8  ;;  %v1190_v37 = vmul.f32 %v1173_v36, %v993_v14 }
 0x692   :  { %1204 = vst [vmem:[#allocation14 + $0x48] sm:$0xff] %v1188_v35 }
 0x693   :  { %1206 = vst [vmem:[#allocation14 + $0x58] sm:$0xff] %v1190_v37 }
 0x695   :  { %v1086_v38 = vpop.f32.mrf.mxu2 }
 0x696   :  { %v1187_v39 = vmul.f32 %v1086_v38, %v906_v15  ;;  %v1144_v40 = vpop.f32.mrf.mxu3 }
 0x697   :  { %v1189_v11 = vmul.f32 %v1144_v40, %v964_v16  ;;  %v1118_v42 = vpop.f32.mrf.mxu0 }
 0x698   :  { %1203 = vst [vmem:[#allocation14 + $0x40] sm:$0xff] %v1187_v39  ;;  %v1192_v43 = vmul.f32 %v1118_v42, %v938_v17  ;;  %v1176_v44 = vpop.f32.mrf.mxu1 }
 0x699   :  { %1205 = vst [vmem:[#allocation14 + $0x50] sm:$0xff] %v1189_v11  ;;  %v1194_v45 = vmul.f32 %v1176_v44, %v996_v18 }
 0x69a   :  { %1208 = vst [vmem:[#allocation14 + $0x68] sm:$0xff] %v1192_v43 }
 0x69b   :  { %1210 = vst [vmem:[#allocation14 + $0x78] sm:$0xff] %v1194_v45 }
 0x69d   :  { %v1089_v47 = vpop.f32.mrf.mxu2 }
 0x69e   :  { %v1191_v49 = vmul.f32 %v1089_v47, %v909_v19  ;;  %v1147_v52 = vpop.f32.mrf.mxu3 }
 0x69f   :  { %v1193_v53 = vmul.f32 %v1147_v52, %v967_v20 }
 0x6a0   :  { %1207 = vst [vmem:[#allocation14 + $0x60] sm:$0xff] %v1191_v49 }
 0x6a1   :  { %1209 = vst [vmem:[#allocation14 + $0x70] sm:$0xff] %v1193_v53 }
 0x6a2   :  { %1253 = dma.vmem_to_hbm [thread:$0]  %s1246_s14, 2048, %s1248_s16, [#allocation15], %s1611_s26, %s1611_s26, %s1612_s17  }
 0x6a3   :  { %1266 = dma.vmem_to_hbm [thread:$0]  %s1259_s30, 512, %s1261_s23, [#allocation15], %s1606_s29, %s1606_s29, %s1607_s0  }
 0x6a4   :  { %1599 = dma.done.wait [#allocation4], 512  }
 0x6a5   :  { %1600 = vsyncadd [#allocation4], 4294966784 }
 0x6a6   :  { %1601 = dma.done.wait [#allocation15], 2560  }
 0x6a7   :  { %1602 = vsyncadd [#allocation15], 4294964736 }
 0x6a8   :  { %1279 = vsyncpa [#allocation3], 1 }
 0x6a9   :  { %1280 = vsyncpa [#allocation6], 1 }
 0x6aa   :  { %1281 = vsyncpa [#allocation9], 1 }
 0x6ab   :  { %1282 = vsyncpa [#allocation12], 1 }
 0x6ac   :  { %1283 = vsyncpa [#allocation4], 1 }
 0x6ad   :  { %1284 = vsyncpa [#allocation15], 1 }

</bundles_post_ra>
